<compile_context>
chip_gen: v5e
topology: v5e:2x2
jax: 0.10.0
libtpu: 0.0.40
codegen_flags: <defaults>
</compile_context>

<pallas_src>
import functools

import numpy as np

import jax
import jax.numpy as jnp
from jax.experimental import pallas as pl
from jax.experimental.pallas import tpu as pltpu


C1, C2, C3 = 10, 10, 8          # conv out-channels of TinyVGG
FC_HIDDEN = 32


# ----------------------------------------------------------------------------
# Fused kernel: whole TinyVGG forward for BT images per grid step.
# ----------------------------------------------------------------------------
def _tiny_vgg_kernel(x_ref, m1_ref, b1_ref, m2_ref, b2_ref, pp1_ref,
                     m3_ref, b3_ref, pp2_ref, w1_ref, fb1_ref, w2_ref, fb2_ref,
                     out_ref,
                     p0, p1, sc1, p2, sc2, s4,
                     *, BT, H, W, Cin):
    f32 = jnp.float32
    H2, W2 = H // 2, W // 2
    H4, W4 = H // 4, W // 4
    K0 = (W + 1) * Cin          # padded input slab width
    K1 = (W + 1) * C1           # padded conv1-activation slab width
    K2 = (W2 + 1) * C2          # padded pooled-conv2 slab width
    R = BT * (H + 1) + 1        # rows of p0 / p1 (BT images + shared pad rows)
    R2 = BT * (H2 + 1) + 1      # rows of p2
    WC = W4 * C3                # per-row width of the flattened classifier input

    def band_conv_relu(src, m_ref, b_ref, rows):
        # 3x3 conv (padding=1) == 3 row-shifted banded matmuls on a padded slab.
        acc = jnp.dot(src[0:rows, :], m_ref[0], preferred_element_type=f32)
        acc = acc + jnp.dot(src[1:rows + 1, :], m_ref[1],
                            preferred_element_type=f32)
        acc = acc + jnp.dot(src[2:rows + 2, :], m_ref[2],
                            preferred_element_type=f32)
        return jnp.maximum(acc + b_ref[...], 0.0)

    # ---- stage 0: scatter BT input images into the padded p0 slab -----------
    # Each input block row-group already carries one trailing zero row (the
    # shared vertical pad between stacked images) and the zero right-pad
    # columns, so only the very first pad row needs zeroing.
    p0[0:1, :] = jnp.zeros((1, K0), f32)
    for i in range(BT):
        p0[i * (H + 1) + 1:(i + 1) * (H + 1) + 1, :] = x_ref[i]

    # ---- conv1 + ReLU -> p1 (padded input slab of conv2) ---------------------
    # m1's N dim is zero-padded to (W+1)*C1, so this single store also writes
    # p1's right zero-pad column block.
    a1 = band_conv_relu(p0, m1_ref, b1_ref, R - 2)            # (R-2, (W+1)*C1)
    p1[1:R - 1, :] = a1
    # Rows between images received mixed-image garbage; re-zero them together
    # with the top/bottom pad rows (BT+1 single-row stores).
    z1 = jnp.zeros((1, K1), f32)
    p1[0:1, :] = z1
    for i in range(BT):
        r = (i + 1) * (H + 1)
        p1[r:r + 1, :] = z1

    # ---- conv2 + ReLU + MaxPool(2,2) -----------------------------------------
    # Horizontal half of the pool: column-pair max via two batched selection
    # matmuls (output already compacted + right-pad block zeroed).
    a2 = band_conv_relu(p1, m2_ref, b2_ref, R - 2)            # (R-2, W*C2)
    cc1 = jnp.maximum(
        jnp.dot(a2, pp1_ref[0:W * C2, :], preferred_element_type=f32),
        jnp.dot(a2, pp1_ref[W * C2:2 * W * C2, :], preferred_element_type=f32))
    sc1[0:R - 2, :] = cc1                                     # (R-2, (W2+1)*C2)
    # Vertical half: per-image row-pair max with stride-2 sublane reads (VPU),
    # written straight into conv3's padded input slab p2.
    z2 = jnp.zeros((1, K2), f32)
    p2[0:1, :] = z2
    for i in range(BT):
        base = i * (H + 1)
        pooled = jnp.maximum(sc1[pl.ds(base, H2, stride=2), :],
                             sc1[pl.ds(base + 1, H2, stride=2), :])
        dst = i * (H2 + 1) + 1
        p2[dst:dst + H2, :] = pooled                          # (H2, (W2+1)*C2)
        r = (i + 1) * (H2 + 1)
        p2[r:r + 1, :] = z2

    # ---- conv3 + ReLU + MaxPool(2,2) -----------------------------------------
    a3 = band_conv_relu(p2, m3_ref, b3_ref, R2 - 2)           # (R2-2, W2*C3)
    cc2 = jnp.maximum(
        jnp.dot(a3, pp2_ref[0:W2 * C3, :], preferred_element_type=f32),
        jnp.dot(a3, pp2_ref[W2 * C3:2 * W2 * C3, :], preferred_element_type=f32))
    sc2[0:R2 - 2, :] = cc2                                    # (R2-2, W4*C3)
    for i in range(BT):
        base = i * (H2 + 1)
        pooled = jnp.maximum(sc2[pl.ds(base, H4, stride=2), :],
                             sc2[pl.ds(base + 1, H4, stride=2), :])
        s4[i * H4:(i + 1) * H4, :] = pooled                   # image-major rows

    # ---- classifier: fc1 (+ReLU) and fc2, batched over the BT images ---------
    # s4 holds image i's H4 pooled rows at [i*H4:(i+1)*H4]; a stride-H4 read
    # gathers "row h of every image" -> fc1 is H4 dots with M = BT.  The fc1
    # weight was row-permuted at pack time, so no NCHW flatten is needed.
    y = fb1_ref[...]                                          # (1, 32)
    for h in range(H4):
        ph = s4[pl.ds(h, BT, stride=H4), :]                   # (BT, W4*C3)
        y = y + jnp.dot(ph, w1_ref[h * WC:(h + 1) * WC, :],
                        preferred_element_type=f32)
    y = jnp.maximum(y, 0.0)                                   # (BT, 32)
    logits = jnp.dot(y, w2_ref[...], preferred_element_type=f32) + fb2_ref[...]
    out_ref[0] = logits.astype(out_ref.dtype)


# ----------------------------------------------------------------------------
# One-time host-side weight packing (numpy): banded conv matrices, tiled
# biases, concatenated pool column-selectors, NHWC-permuted fc1 weight.
# ----------------------------------------------------------------------------
def pack_tiny_vgg_params(params, image_size):
    Cin, H, W = image_size
    assert H % 4 == 0 and W % 4 == 0, "TinyVGG kernel assumes H, W divisible by 4"
    H2, W2 = H // 2, W // 2
    H4, W4 = H // 4, W // 4
    f32 = np.float32

    def band(w_oihw, Wd, n_cols):
        # M[kh, u*Ci+ci, w*Co+co] = torch_w[co, ci, kh, u-w+1] (valid taps), so
        # conv(padding=1) == sum_kh padded_slab[kh:kh+rows, :] @ M[kh].
        # Extra zero output columns pad N to n_cols (next slab's right pad).
        wn = np.asarray(w_oihw, dtype=f32)
        Co, Ci, KH, KW = wn.shape
        out = np.zeros((KH, (Wd + 1) * Ci, n_cols), f32)
        for kh in range(KH):
            for w in range(Wd):
                for kw in range(KW):
                    u = w + kw - 1
                    if 0 <= u <= Wd:
                        out[kh, u * Ci:(u + 1) * Ci, w * Co:(w + 1) * Co] = \
                            wn[:, :, kh, kw].T
        return out

    def bias_row(b, reps, width):
        v = np.tile(np.asarray(b, dtype=f32), reps)
        return np.pad(v, (0, width - v.size)).reshape(1, width)

    def col_pool(Wd, C, n_cols):
        # [Pe ; Po] stacked on axis 0: Pe selects even-w columns, Po odd-w
        # columns, compacted into lane layout w2*C + c (+ zero right-pad cols).
        pe = np.zeros((Wd * C, n_cols), f32)
        po = np.zeros((Wd * C, n_cols), f32)
        for w2 in range(Wd // 2):
            for c in range(C):
                pe[(2 * w2) * C + c, w2 * C + c] = 1.0
                po[(2 * w2 + 1) * C + c, w2 * C + c] = 1.0
        return np.concatenate([pe, po], axis=0)

    # fc1 weight rows: torch NCHW-flatten order (c, h, w) -> slab order (h, w, c).
    fc1_w = np.asarray(params["fc1_w"], dtype=f32)            # (C3*H4*W4, 32)
    w1p = (fc1_w.reshape(C3, H4, W4, -1).transpose(1, 2, 0, 3)
           .reshape(H4 * W4 * C3, -1))

    return dict(
        m1=jnp.asarray(band(params["conv1_w"], W, (W + 1) * C1)),
        b1=jnp.asarray(bias_row(params["conv1_b"], W, (W + 1) * C1)),
        m2=jnp.asarray(band(params["conv2_w"], W, W * C2)),
        b2=jnp.asarray(bias_row(params["conv2_b"], W, W * C2)),
        pp1=jnp.asarray(col_pool(W, C2, (W2 + 1) * C2)),
        m3=jnp.asarray(band(params["conv3_w"], W2, W2 * C3)),
        b3=jnp.asarray(bias_row(params["conv3_b"], W2, W2 * C3)),
        pp2=jnp.asarray(col_pool(W2, C3, W4 * C3)),
        w1=jnp.asarray(w1p),
        fb1=jnp.asarray(np.asarray(params["fc1_b"], f32).reshape(1, -1)),
        w2=jnp.asarray(np.asarray(params["fc2_w"], f32)),
        fb2=jnp.asarray(np.asarray(params["fc2_b"], f32).reshape(1, -1)),
    )


# ----------------------------------------------------------------------------
# Forward wrapper: one pallas_call, grid over batch tiles.
# ----------------------------------------------------------------------------
def tiny_vgg_forward(packed, x_nchw, *, b_tile=None):
    B, Cin, H, W = x_nchw.shape
    assert H % 4 == 0 and W % 4 == 0, "TinyVGG kernel assumes H, W divisible by 4"
    H2, W2 = H // 2, W // 2
    H4, W4 = H // 4, W // 4
    NC = packed["fb2"].shape[1]
    f32 = jnp.float32

    if b_tile is None:
        # Amortise per-step overhead but keep >=2 grid steps when possible so a
        # megacore part ("parallel") can still split work across TensorCores.
        b_tile = max(1, min(8, B // 2))
    BT = int(b_tile)
    nsteps = pl.cdiv(B, BT)
    Bp = nsteps * BT

    # Host-side layout transform (tiny): NCHW -> lane-dense (B, H, W*Cin) slab,
    # plus one trailing zero row per image (shared vertical pad between the
    # images stacked inside the kernel) and the zero right-pad column block.
    x_slab = jnp.transpose(x_nchw, (0, 2, 3, 1)).reshape(B, H, W * Cin)
    x_slab = jnp.pad(x_slab.astype(f32), ((0, Bp - B), (0, 1), (0, Cin)))

    weights = (packed["m1"], packed["b1"], packed["m2"], packed["b2"],
               packed["pp1"], packed["m3"], packed["b3"], packed["pp2"],
               packed["w1"], packed["fb1"], packed["w2"], packed["fb2"])

    def const_spec(a):
        return pl.BlockSpec(a.shape, lambda g, _n=a.ndim: (0,) * _n)

    R = BT * (H + 1) + 1
    R2 = BT * (H2 + 1) + 1

    kernel = functools.partial(_tiny_vgg_kernel, BT=BT, H=H, W=W, Cin=Cin)

    out = pl.pallas_call(
        kernel,
        out_shape=jax.ShapeDtypeStruct((nsteps, BT, NC), f32),
        grid=(nsteps,),
        in_specs=[pl.BlockSpec((BT, H + 1, (W + 1) * Cin), lambda g: (g, 0, 0))]
                 + [const_spec(wt) for wt in weights],
        out_specs=pl.BlockSpec((1, BT, NC), lambda g: (g, 0, 0)),
        scratch_shapes=[
            pltpu.VMEM((R, (W + 1) * Cin), f32),            # p0: padded input
            pltpu.VMEM((R, (W + 1) * C1), f32),             # p1: padded conv1 act
            pltpu.VMEM((BT * (H + 1), (W2 + 1) * C2), f32),  # sc1: col-pooled conv2
            pltpu.VMEM((R2, (W2 + 1) * C2), f32),           # p2: padded pooled act
            pltpu.VMEM((BT * (H2 + 1), W4 * C3), f32),      # sc2: col-pooled conv3
            pltpu.VMEM((BT * H4, W4 * C3), f32),            # s4: classifier input
        ],
        compiler_params=pltpu.CompilerParams(
            dimension_semantics=("parallel",)),
    )(x_slab, *weights)
    return out.reshape(Bp, NC)[:B]


# ----------------------------------------------------------------------------
# Parameters (same shapes / semantics as the PyTorch TinyVGG module).
# ----------------------------------------------------------------------------
def init_tiny_vgg_params(key, image_size, num_classes, dtype=jnp.float32):
    c_in, h, w = image_size
    flat = C3 * (h // 4) * (w // 4)
    keys = jax.random.split(key, 10)
    s = 0.1
    return {
        "conv1_w": s * jax.random.normal(keys[0], (C1, c_in, 3, 3), dtype),
        "conv1_b": s * jax.random.normal(keys[1], (C1,), dtype),
        "conv2_w": s * jax.random.normal(keys[2], (C2, C1, 3, 3), dtype),
        "conv2_b": s * jax.random.normal(keys[3], (C2,), dtype),
        "conv3_w": s * jax.random.normal(keys[4], (C3, C2, 3, 3), dtype),
        "conv3_b": s * jax.random.normal(keys[5], (C3,), dtype),
        # Linear weights stored as (in, out), i.e. torch weight.T
        "fc1_w": s * jax.random.normal(keys[6], (flat, FC_HIDDEN), dtype),
        "fc1_b": s * jax.random.normal(keys[7], (FC_HIDDEN,), dtype),
        "fc2_w": s * jax.random.normal(keys[8], (FC_HIDDEN, num_classes), dtype),
        "fc2_b": s * jax.random.normal(keys[9], (num_classes,), dtype),
    }


def tiny_vgg_reference(params, x_nchw):
    """Pure-JAX/XLA reference of the PyTorch module (for self-check)."""
    def conv(x, w, b):
        y = jax.lax.conv_general_dilated(
            x, w, (1, 1), "SAME",
            dimension_numbers=("NCHW", "OIHW", "NCHW"))
        return jax.nn.relu(y + b.reshape(1, -1, 1, 1))

    def pool(x):
        return jax.lax.reduce_window(x, -jnp.inf, jax.lax.max,
                                     (1, 1, 2, 2), (1, 1, 2, 2), "VALID")

    x = conv(x_nchw, params["conv1_w"], params["conv1_b"])
    x = conv(x, params["conv2_w"], params["conv2_b"])
    x = pool(x)
    x = conv(x, params["conv3_w"], params["conv3_b"])
    x = pool(x)
    x = x.reshape(x.shape[0], -1)                 # NCHW flatten == torch .view
    x = jax.nn.relu(x @ params["fc1_w"] + params["fc1_b"])
    return x @ params["fc2_w"] + params["fc2_b"]


if __name__ == "__main__":
    image_size = [4, 16, 16]    # (C, H, W)
    num_classes = 10
    batch = 2

    key = jax.random.PRNGKey(0)
    pkey, xkey = jax.random.split(key)
    params = init_tiny_vgg_params(pkey, image_size, num_classes)
    x = jax.random.normal(xkey, (batch, *image_size), jnp.float32)   # NCHW

    packed = pack_tiny_vgg_params(params, image_size)

    fwd = jax.jit(tiny_vgg_forward)
    out = jax.block_until_ready(fwd(packed, x))

    assert out.shape == (batch, num_classes), out.shape
    assert bool(jnp.all(jnp.isfinite(out)))

    # Numerical self-check against the XLA reference (tolerance covers TPU
    # default-precision f32 matmul rounding).
    ref = tiny_vgg_reference(params, x)
    err = float(jnp.max(jnp.abs(out - ref)))
    assert err < 2e-2, f"max abs error vs reference: {err}"

    print("KERNEL_OK")
</pallas_src>

<mosaic_0001>
module attributes {stable_mosaic.version = 11 : i64} {
  func.func @_tiny_vgg_kernel(%arg0: i32, %arg1: memref<1x17x68xf32, #tpu.memory_space<vmem>>, %arg2: memref<3x68x170xf32, #tpu.memory_space<vmem>>, %arg3: memref<1x170xf32, #tpu.memory_space<vmem>>, %arg4: memref<3x170x160xf32, #tpu.memory_space<vmem>>, %arg5: memref<1x160xf32, #tpu.memory_space<vmem>>, %arg6: memref<320x90xf32, #tpu.memory_space<vmem>>, %arg7: memref<3x90x64xf32, #tpu.memory_space<vmem>>, %arg8: memref<1x64xf32, #tpu.memory_space<vmem>>, %arg9: memref<128x32xf32, #tpu.memory_space<vmem>>, %arg10: memref<128x32xf32, #tpu.memory_space<vmem>>, %arg11: memref<1x32xf32, #tpu.memory_space<vmem>>, %arg12: memref<32x10xf32, #tpu.memory_space<vmem>>, %arg13: memref<1x10xf32, #tpu.memory_space<vmem>>, %arg14: memref<1x1x10xf32, #tpu.memory_space<vmem>>, %arg15: memref<18x68xf32, #tpu.memory_space<vmem>>, %arg16: memref<18x170xf32, #tpu.memory_space<vmem>>, %arg17: memref<17x90xf32, #tpu.memory_space<vmem>>, %arg18: memref<10x90xf32, #tpu.memory_space<vmem>>, %arg19: memref<9x32xf32, #tpu.memory_space<vmem>>, %arg20: memref<4x32xf32, #tpu.memory_space<vmem>>) attributes {dimension_semantics = [#tpu.dimension_semantics<parallel>], iteration_bounds = array<i64: 2>, scalar_prefetch = 0 : i64, scratch_operands = 6 : i64, tpu.core_type = #tpu.core_type<tc>, window_params = [{transform_indices = @transform_0, window_bounds = array<i64: 1, 17, 68>}, {pipeline_mode = #tpu.pipeline_mode<synchronous>, transform_indices = @transform_1, window_bounds = array<i64: 3, 68, 170>}, {pipeline_mode = #tpu.pipeline_mode<synchronous>, transform_indices = @transform_2, window_bounds = array<i64: 1, 170>}, {pipeline_mode = #tpu.pipeline_mode<synchronous>, transform_indices = @transform_3, window_bounds = array<i64: 3, 170, 160>}, {pipeline_mode = #tpu.pipeline_mode<synchronous>, transform_indices = @transform_4, window_bounds = array<i64: 1, 160>}, {pipeline_mode = #tpu.pipeline_mode<synchronous>, transform_indices = @transform_5, window_bounds = array<i64: 320, 90>}, {pipeline_mode = #tpu.pipeline_mode<synchronous>, transform_indices = @transform_6, window_bounds = array<i64: 3, 90, 64>}, {pipeline_mode = #tpu.pipeline_mode<synchronous>, transform_indices = @transform_7, window_bounds = array<i64: 1, 64>}, {pipeline_mode = #tpu.pipeline_mode<synchronous>, transform_indices = @transform_8, window_bounds = array<i64: 128, 32>}, {pipeline_mode = #tpu.pipeline_mode<synchronous>, transform_indices = @transform_9, window_bounds = array<i64: 128, 32>}, {pipeline_mode = #tpu.pipeline_mode<synchronous>, transform_indices = @transform_10, window_bounds = array<i64: 1, 32>}, {pipeline_mode = #tpu.pipeline_mode<synchronous>, transform_indices = @transform_11, window_bounds = array<i64: 32, 10>}, {pipeline_mode = #tpu.pipeline_mode<synchronous>, transform_indices = @transform_12, window_bounds = array<i64: 1, 10>}, {transform_indices = @transform_13, window_bounds = array<i64: 1, 1, 10>}]} {
    %cst = arith.constant 0.000000e+00 : f32
    %0 = vector.broadcast %cst : f32 to vector<1x68xf32>
    %c0 = arith.constant 0 : index
    %c0_0 = arith.constant 0 : index
    %1 = vector.load %arg15[%c0, %c0_0] : memref<18x68xf32, #tpu.memory_space<vmem>>, vector<1x68xf32>
    tpu.vector_store %arg15[%c0, %c0_0], %0 {strides = array<i32>} : memref<18x68xf32, #tpu.memory_space<vmem>>, vector<1x68xf32>,
    %c0_1 = arith.constant 0 : index
    %c0_2 = arith.constant 0 : index
    %c0_3 = arith.constant 0 : index
    %2 = vector.load %arg1[%c0_1, %c0_2, %c0_3] : memref<1x17x68xf32, #tpu.memory_space<vmem>>, vector<1x17x68xf32>
    %3 = vector.shape_cast %2 : vector<1x17x68xf32> to vector<17x68xf32>
    %c1 = arith.constant 1 : index
    %c0_4 = arith.constant 0 : index
    %4 = vector.load %arg15[%c1, %c0_4] : memref<18x68xf32, #tpu.memory_space<vmem>>, vector<17x68xf32>
    tpu.vector_store %arg15[%c1, %c0_4], %3 {strides = array<i32>} : memref<18x68xf32, #tpu.memory_space<vmem>>, vector<17x68xf32>,
    %c0_5 = arith.constant 0 : index
    %c0_6 = arith.constant 0 : index
    %5 = vector.load %arg15[%c0_5, %c0_6] : memref<18x68xf32, #tpu.memory_space<vmem>>, vector<16x68xf32>
    %c0_7 = arith.constant 0 : index
    %c0_8 = arith.constant 0 : index
    %c0_9 = arith.constant 0 : index
    %6 = vector.load %arg2[%c0_7, %c0_8, %c0_9] : memref<3x68x170xf32, #tpu.memory_space<vmem>>, vector<1x68x170xf32>
    %7 = vector.shape_cast %6 : vector<1x68x170xf32> to vector<68x170xf32>
    %cst_10 = arith.constant dense<0.000000e+00> : vector<16x170xf32>
    %8 = tpu.matmul %5, %7, %cst_10 {dimension_numbers = #tpu.dot_dimension_numbers<[1], [0], [0], [1], [0, 0, 1, 1], [], []>} : vector<16x68xf32>, vector<68x170xf32>, vector<16x170xf32> -> vector<16x170xf32>
    %c1_11 = arith.constant 1 : index
    %c0_12 = arith.constant 0 : index
    %9 = vector.load %arg15[%c1_11, %c0_12] : memref<18x68xf32, #tpu.memory_space<vmem>>, vector<16x68xf32>
    %c1_13 = arith.constant 1 : index
    %c0_14 = arith.constant 0 : index
    %c0_15 = arith.constant 0 : index
    %10 = vector.load %arg2[%c1_13, %c0_14, %c0_15] : memref<3x68x170xf32, #tpu.memory_space<vmem>>, vector<1x68x170xf32>
    %11 = vector.shape_cast %10 : vector<1x68x170xf32> to vector<68x170xf32>
    %cst_16 = arith.constant dense<0.000000e+00> : vector<16x170xf32>
    %12 = tpu.matmul %9, %11, %cst_16 {dimension_numbers = #tpu.dot_dimension_numbers<[1], [0], [0], [1], [0, 0, 1, 1], [], []>} : vector<16x68xf32>, vector<68x170xf32>, vector<16x170xf32> -> vector<16x170xf32>
    %13 = arith.addf %8, %12 : vector<16x170xf32>
    %c2 = arith.constant 2 : index
    %c0_17 = arith.constant 0 : index
    %14 = vector.load %arg15[%c2, %c0_17] : memref<18x68xf32, #tpu.memory_space<vmem>>, vector<16x68xf32>
    %c2_18 = arith.constant 2 : index
    %c0_19 = arith.constant 0 : index
    %c0_20 = arith.constant 0 : index
    %15 = vector.load %arg2[%c2_18, %c0_19, %c0_20] : memref<3x68x170xf32, #tpu.memory_space<vmem>>, vector<1x68x170xf32>
    %16 = vector.shape_cast %15 : vector<1x68x170xf32> to vector<68x170xf32>
    %cst_21 = arith.constant dense<0.000000e+00> : vector<16x170xf32>
    %17 = tpu.matmul %14, %16, %cst_21 {dimension_numbers = #tpu.dot_dimension_numbers<[1], [0], [0], [1], [0, 0, 1, 1], [], []>} : vector<16x68xf32>, vector<68x170xf32>, vector<16x170xf32> -> vector<16x170xf32>
    %18 = arith.addf %13, %17 : vector<16x170xf32>
    %c0_22 = arith.constant 0 : index
    %c0_23 = arith.constant 0 : index
    %19 = vector.load %arg3[%c0_22, %c0_23] : memref<1x170xf32, #tpu.memory_space<vmem>>, vector<1x170xf32>
    %20 = vector.broadcast %19 : vector<1x170xf32> to vector<16x170xf32>
    %21 = arith.addf %18, %20 : vector<16x170xf32>
    %cst_24 = arith.constant 0.000000e+00 : f32
    %22 = vector.broadcast %cst_24 : f32 to vector<16x170xf32>
    %23 = arith.maximumf %21, %22 : vector<16x170xf32>
    %c1_25 = arith.constant 1 : index
    %c0_26 = arith.constant 0 : index
    %24 = vector.load %arg16[%c1_25, %c0_26] : memref<18x170xf32, #tpu.memory_space<vmem>>, vector<16x170xf32>
    tpu.vector_store %arg16[%c1_25, %c0_26], %23 {strides = array<i32>} : memref<18x170xf32, #tpu.memory_space<vmem>>, vector<16x170xf32>,
    %cst_27 = arith.constant 0.000000e+00 : f32
    %25 = vector.broadcast %cst_27 : f32 to vector<1x170xf32>
    %c0_28 = arith.constant 0 : index
    %c0_29 = arith.constant 0 : index
    %26 = vector.load %arg16[%c0_28, %c0_29] : memref<18x170xf32, #tpu.memory_space<vmem>>, vector<1x170xf32>
    tpu.vector_store %arg16[%c0_28, %c0_29], %25 {strides = array<i32>} : memref<18x170xf32, #tpu.memory_space<vmem>>, vector<1x170xf32>,
    %c17 = arith.constant 17 : index
    %c0_30 = arith.constant 0 : index
    %27 = vector.load %arg16[%c17, %c0_30] : memref<18x170xf32, #tpu.memory_space<vmem>>, vector<1x170xf32>
    tpu.vector_store %arg16[%c17, %c0_30], %25 {strides = array<i32>} : memref<18x170xf32, #tpu.memory_space<vmem>>, vector<1x170xf32>,
    %c0_31 = arith.constant 0 : index
    %c0_32 = arith.constant 0 : index
    %28 = vector.load %arg16[%c0_31, %c0_32] : memref<18x170xf32, #tpu.memory_space<vmem>>, vector<16x170xf32>
    %c0_33 = arith.constant 0 : index
    %c0_34 = arith.constant 0 : index
    %c0_35 = arith.constant 0 : index
    %29 = vector.load %arg4[%c0_33, %c0_34, %c0_35] : memref<3x170x160xf32, #tpu.memory_space<vmem>>, vector<1x170x160xf32>
    %30 = vector.shape_cast %29 : vector<1x170x160xf32> to vector<170x160xf32>
    %cst_36 = arith.constant dense<0.000000e+00> : vector<16x160xf32>
    %31 = tpu.matmul %28, %30, %cst_36 {dimension_numbers = #tpu.dot_dimension_numbers<[1], [0], [0], [1], [0, 0, 1, 1], [], []>} : vector<16x170xf32>, vector<170x160xf32>, vector<16x160xf32> -> vector<16x160xf32>
    %c1_37 = arith.constant 1 : index
    %c0_38 = arith.constant 0 : index
    %32 = vector.load %arg16[%c1_37, %c0_38] : memref<18x170xf32, #tpu.memory_space<vmem>>, vector<16x170xf32>
    %c1_39 = arith.constant 1 : index
    %c0_40 = arith.constant 0 : index
    %c0_41 = arith.constant 0 : index
    %33 = vector.load %arg4[%c1_39, %c0_40, %c0_41] : memref<3x170x160xf32, #tpu.memory_space<vmem>>, vector<1x170x160xf32>
    %34 = vector.shape_cast %33 : vector<1x170x160xf32> to vector<170x160xf32>
    %cst_42 = arith.constant dense<0.000000e+00> : vector<16x160xf32>
    %35 = tpu.matmul %32, %34, %cst_42 {dimension_numbers = #tpu.dot_dimension_numbers<[1], [0], [0], [1], [0, 0, 1, 1], [], []>} : vector<16x170xf32>, vector<170x160xf32>, vector<16x160xf32> -> vector<16x160xf32>
    %36 = arith.addf %31, %35 : vector<16x160xf32>
    %c2_43 = arith.constant 2 : index
    %c0_44 = arith.constant 0 : index
    %37 = vector.load %arg16[%c2_43, %c0_44] : memref<18x170xf32, #tpu.memory_space<vmem>>, vector<16x170xf32>
    %c2_45 = arith.constant 2 : index
    %c0_46 = arith.constant 0 : index
    %c0_47 = arith.constant 0 : index
    %38 = vector.load %arg4[%c2_45, %c0_46, %c0_47] : memref<3x170x160xf32, #tpu.memory_space<vmem>>, vector<1x170x160xf32>
    %39 = vector.shape_cast %38 : vector<1x170x160xf32> to vector<170x160xf32>
    %cst_48 = arith.constant dense<0.000000e+00> : vector<16x160xf32>
    %40 = tpu.matmul %37, %39, %cst_48 {dimension_numbers = #tpu.dot_dimension_numbers<[1], [0], [0], [1], [0, 0, 1, 1], [], []>} : vector<16x170xf32>, vector<170x160xf32>, vector<16x160xf32> -> vector<16x160xf32>
    %41 = arith.addf %36, %40 : vector<16x160xf32>
    %c0_49 = arith.constant 0 : index
    %c0_50 = arith.constant 0 : index
    %42 = vector.load %arg5[%c0_49, %c0_50] : memref<1x160xf32, #tpu.memory_space<vmem>>, vector<1x160xf32>
    %43 = vector.broadcast %42 : vector<1x160xf32> to vector<16x160xf32>
    %44 = arith.addf %41, %43 : vector<16x160xf32>
    %cst_51 = arith.constant 0.000000e+00 : f32
    %45 = vector.broadcast %cst_51 : f32 to vector<16x160xf32>
    %46 = arith.maximumf %44, %45 : vector<16x160xf32>
    %c0_52 = arith.constant 0 : index
    %c0_53 = arith.constant 0 : index
    %47 = vector.load %arg6[%c0_52, %c0_53] : memref<320x90xf32, #tpu.memory_space<vmem>>, vector<160x90xf32>
    %cst_54 = arith.constant dense<0.000000e+00> : vector<16x90xf32>
    %48 = tpu.matmul %46, %47, %cst_54 {dimension_numbers = #tpu.dot_dimension_numbers<[1], [0], [0], [1], [0, 0, 1, 1], [], []>} : vector<16x160xf32>, vector<160x90xf32>, vector<16x90xf32> -> vector<16x90xf32>
    %c160 = arith.constant 160 : index
    %c0_55 = arith.constant 0 : index
    %49 = vector.load %arg6[%c160, %c0_55] : memref<320x90xf32, #tpu.memory_space<vmem>>, vector<160x90xf32>
    %cst_56 = arith.constant dense<0.000000e+00> : vector<16x90xf32>
    %50 = tpu.matmul %46, %49, %cst_56 {dimension_numbers = #tpu.dot_dimension_numbers<[1], [0], [0], [1], [0, 0, 1, 1], [], []>} : vector<16x160xf32>, vector<160x90xf32>, vector<16x90xf32> -> vector<16x90xf32>
    %51 = arith.maximumf %48, %50 : vector<16x90xf32>
    %c0_57 = arith.constant 0 : index
    %c0_58 = arith.constant 0 : index
    %52 = vector.load %arg17[%c0_57, %c0_58] : memref<17x90xf32, #tpu.memory_space<vmem>>, vector<16x90xf32>
    tpu.vector_store %arg17[%c0_57, %c0_58], %51 {strides = array<i32>} : memref<17x90xf32, #tpu.memory_space<vmem>>, vector<16x90xf32>,
    %cst_59 = arith.constant 0.000000e+00 : f32
    %53 = vector.broadcast %cst_59 : f32 to vector<1x90xf32>
    %c0_60 = arith.constant 0 : index
    %c0_61 = arith.constant 0 : index
    %54 = vector.load %arg18[%c0_60, %c0_61] : memref<10x90xf32, #tpu.memory_space<vmem>>, vector<1x90xf32>
    tpu.vector_store %arg18[%c0_60, %c0_61], %53 {strides = array<i32>} : memref<10x90xf32, #tpu.memory_space<vmem>>, vector<1x90xf32>,
    %c0_62 = arith.constant 0 : index
    %c0_63 = arith.constant 0 : index
    %55 = tpu.strided_load %arg17[%c0_62, %c0_63] {strides = array<i32: 2, 1>} : memref<17x90xf32, #tpu.memory_space<vmem>>, vector<8x90xf32>
    %c1_64 = arith.constant 1 : index
    %c0_65 = arith.constant 0 : index
    %56 = tpu.strided_load %arg17[%c1_64, %c0_65] {strides = array<i32: 2, 1>} : memref<17x90xf32, #tpu.memory_space<vmem>>, vector<8x90xf32>
    %57 = arith.maximumf %55, %56 : vector<8x90xf32>
    %c1_66 = arith.constant 1 : index
    %c0_67 = arith.constant 0 : index
    %58 = vector.load %arg18[%c1_66, %c0_67] : memref<10x90xf32, #tpu.memory_space<vmem>>, vector<8x90xf32>
    tpu.vector_store %arg18[%c1_66, %c0_67], %57 {strides = array<i32>} : memref<10x90xf32, #tpu.memory_space<vmem>>, vector<8x90xf32>,
    %c9 = arith.constant 9 : index
    %c0_68 = arith.constant 0 : index
    %59 = vector.load %arg18[%c9, %c0_68] : memref<10x90xf32, #tpu.memory_space<vmem>>, vector<1x90xf32>
    tpu.vector_store %arg18[%c9, %c0_68], %53 {strides = array<i32>} : memref<10x90xf32, #tpu.memory_space<vmem>>, vector<1x90xf32>,
    %c0_69 = arith.constant 0 : index
    %c0_70 = arith.constant 0 : index
    %60 = vector.load %arg18[%c0_69, %c0_70] : memref<10x90xf32, #tpu.memory_space<vmem>>, vector<8x90xf32>
    %c0_71 = arith.constant 0 : index
    %c0_72 = arith.constant 0 : index
    %c0_73 = arith.constant 0 : index
    %61 = vector.load %arg7[%c0_71, %c0_72, %c0_73] : memref<3x90x64xf32, #tpu.memory_space<vmem>>, vector<1x90x64xf32>
    %62 = vector.shape_cast %61 : vector<1x90x64xf32> to vector<90x64xf32>
    %cst_74 = arith.constant dense<0.000000e+00> : vector<8x64xf32>
    %63 = tpu.matmul %60, %62, %cst_74 {dimension_numbers = #tpu.dot_dimension_numbers<[1], [0], [0], [1], [0, 0, 1, 1], [], []>} : vector<8x90xf32>, vector<90x64xf32>, vector<8x64xf32> -> vector<8x64xf32>
    %c1_75 = arith.constant 1 : index
    %c0_76 = arith.constant 0 : index
    %64 = vector.load %arg18[%c1_75, %c0_76] : memref<10x90xf32, #tpu.memory_space<vmem>>, vector<8x90xf32>
    %c1_77 = arith.constant 1 : index
    %c0_78 = arith.constant 0 : index
    %c0_79 = arith.constant 0 : index
    %65 = vector.load %arg7[%c1_77, %c0_78, %c0_79] : memref<3x90x64xf32, #tpu.memory_space<vmem>>, vector<1x90x64xf32>
    %66 = vector.shape_cast %65 : vector<1x90x64xf32> to vector<90x64xf32>
    %cst_80 = arith.constant dense<0.000000e+00> : vector<8x64xf32>
    %67 = tpu.matmul %64, %66, %cst_80 {dimension_numbers = #tpu.dot_dimension_numbers<[1], [0], [0], [1], [0, 0, 1, 1], [], []>} : vector<8x90xf32>, vector<90x64xf32>, vector<8x64xf32> -> vector<8x64xf32>
    %68 = arith.addf %63, %67 : vector<8x64xf32>
    %c2_81 = arith.constant 2 : index
    %c0_82 = arith.constant 0 : index
    %69 = vector.load %arg18[%c2_81, %c0_82] : memref<10x90xf32, #tpu.memory_space<vmem>>, vector<8x90xf32>
    %c2_83 = arith.constant 2 : index
    %c0_84 = arith.constant 0 : index
    %c0_85 = arith.constant 0 : index
    %70 = vector.load %arg7[%c2_83, %c0_84, %c0_85] : memref<3x90x64xf32, #tpu.memory_space<vmem>>, vector<1x90x64xf32>
    %71 = vector.shape_cast %70 : vector<1x90x64xf32> to vector<90x64xf32>
    %cst_86 = arith.constant dense<0.000000e+00> : vector<8x64xf32>
    %72 = tpu.matmul %69, %71, %cst_86 {dimension_numbers = #tpu.dot_dimension_numbers<[1], [0], [0], [1], [0, 0, 1, 1], [], []>} : vector<8x90xf32>, vector<90x64xf32>, vector<8x64xf32> -> vector<8x64xf32>
    %73 = arith.addf %68, %72 : vector<8x64xf32>
    %c0_87 = arith.constant 0 : index
    %c0_88 = arith.constant 0 : index
    %74 = vector.load %arg8[%c0_87, %c0_88] : memref<1x64xf32, #tpu.memory_space<vmem>>, vector<1x64xf32>
    %75 = vector.broadcast %74 : vector<1x64xf32> to vector<8x64xf32>
    %76 = arith.addf %73, %75 : vector<8x64xf32>
    %cst_89 = arith.constant 0.000000e+00 : f32
    %77 = vector.broadcast %cst_89 : f32 to vector<8x64xf32>
    %78 = arith.maximumf %76, %77 : vector<8x64xf32>
    %c0_90 = arith.constant 0 : index
    %c0_91 = arith.constant 0 : index
    %79 = vector.load %arg9[%c0_90, %c0_91] : memref<128x32xf32, #tpu.memory_space<vmem>>, vector<64x32xf32>
    %cst_92 = arith.constant dense<0.000000e+00> : vector<8x32xf32>
    %80 = tpu.matmul %78, %79, %cst_92 {dimension_numbers = #tpu.dot_dimension_numbers<[1], [0], [0], [1], [0, 0, 1, 1], [], []>} : vector<8x64xf32>, vector<64x32xf32>, vector<8x32xf32> -> vector<8x32xf32>
    %c64 = arith.constant 64 : index
    %c0_93 = arith.constant 0 : index
    %81 = vector.load %arg9[%c64, %c0_93] : memref<128x32xf32, #tpu.memory_space<vmem>>, vector<64x32xf32>
    %cst_94 = arith.constant dense<0.000000e+00> : vector<8x32xf32>
    %82 = tpu.matmul %78, %81, %cst_94 {dimension_numbers = #tpu.dot_dimension_numbers<[1], [0], [0], [1], [0, 0, 1, 1], [], []>} : vector<8x64xf32>, vector<64x32xf32>, vector<8x32xf32> -> vector<8x32xf32>
    %83 = arith.maximumf %80, %82 : vector<8x32xf32>
    %c0_95 = arith.constant 0 : index
    %c0_96 = arith.constant 0 : index
    %84 = vector.load %arg19[%c0_95, %c0_96] : memref<9x32xf32, #tpu.memory_space<vmem>>, vector<8x32xf32>
    tpu.vector_store %arg19[%c0_95, %c0_96], %83 {strides = array<i32>} : memref<9x32xf32, #tpu.memory_space<vmem>>, vector<8x32xf32>,
    %c0_97 = arith.constant 0 : index
    %c0_98 = arith.constant 0 : index
    %85 = tpu.strided_load %arg19[%c0_97, %c0_98] {strides = array<i32: 2, 1>} : memref<9x32xf32, #tpu.memory_space<vmem>>, vector<4x32xf32>
    %c1_99 = arith.constant 1 : index
    %c0_100 = arith.constant 0 : index
    %86 = tpu.strided_load %arg19[%c1_99, %c0_100] {strides = array<i32: 2, 1>} : memref<9x32xf32, #tpu.memory_space<vmem>>, vector<4x32xf32>
    %87 = arith.maximumf %85, %86 : vector<4x32xf32>
    %c0_101 = arith.constant 0 : index
    %c0_102 = arith.constant 0 : index
    %88 = vector.load %arg20[%c0_101, %c0_102] : memref<4x32xf32, #tpu.memory_space<vmem>>, vector<4x32xf32>
    tpu.vector_store %arg20[%c0_101, %c0_102], %87 {strides = array<i32>} : memref<4x32xf32, #tpu.memory_space<vmem>>, vector<4x32xf32>,
    %c0_103 = arith.constant 0 : index
    %c0_104 = arith.constant 0 : index
    %89 = vector.load %arg11[%c0_103, %c0_104] : memref<1x32xf32, #tpu.memory_space<vmem>>, vector<1x32xf32>
    %c0_105 = arith.constant 0 : index
    %c0_106 = arith.constant 0 : index
    %90 = tpu.strided_load %arg20[%c0_105, %c0_106] {strides = array<i32: 4, 1>} : memref<4x32xf32, #tpu.memory_space<vmem>>, vector<1x32xf32>
    %c0_107 = arith.constant 0 : index
    %c0_108 = arith.constant 0 : index
    %91 = vector.load %arg10[%c0_107, %c0_108] : memref<128x32xf32, #tpu.memory_space<vmem>>, vector<32x32xf32>
    %cst_109 = arith.constant dense<0.000000e+00> : vector<1x32xf32>
    %92 = tpu.matmul %90, %91, %cst_109 {dimension_numbers = #tpu.dot_dimension_numbers<[1], [0], [0], [1], [0, 0, 1, 1], [], []>} : vector<1x32xf32>, vector<32x32xf32>, vector<1x32xf32> -> vector<1x32xf32>
    %93 = arith.addf %89, %92 : vector<1x32xf32>
    %c1_110 = arith.constant 1 : index
    %c0_111 = arith.constant 0 : index
    %94 = tpu.strided_load %arg20[%c1_110, %c0_111] {strides = array<i32: 4, 1>} : memref<4x32xf32, #tpu.memory_space<vmem>>, vector<1x32xf32>
    %c32 = arith.constant 32 : index
    %c0_112 = arith.constant 0 : index
    %95 = vector.load %arg10[%c32, %c0_112] : memref<128x32xf32, #tpu.memory_space<vmem>>, vector<32x32xf32>
    %cst_113 = arith.constant dense<0.000000e+00> : vector<1x32xf32>
    %96 = tpu.matmul %94, %95, %cst_113 {dimension_numbers = #tpu.dot_dimension_numbers<[1], [0], [0], [1], [0, 0, 1, 1], [], []>} : vector<1x32xf32>, vector<32x32xf32>, vector<1x32xf32> -> vector<1x32xf32>
    %97 = arith.addf %93, %96 : vector<1x32xf32>
    %c2_114 = arith.constant 2 : index
    %c0_115 = arith.constant 0 : index
    %98 = tpu.strided_load %arg20[%c2_114, %c0_115] {strides = array<i32: 4, 1>} : memref<4x32xf32, #tpu.memory_space<vmem>>, vector<1x32xf32>
    %c64_116 = arith.constant 64 : index
    %c0_117 = arith.constant 0 : index
    %99 = vector.load %arg10[%c64_116, %c0_117] : memref<128x32xf32, #tpu.memory_space<vmem>>, vector<32x32xf32>
    %cst_118 = arith.constant dense<0.000000e+00> : vector<1x32xf32>
    %100 = tpu.matmul %98, %99, %cst_118 {dimension_numbers = #tpu.dot_dimension_numbers<[1], [0], [0], [1], [0, 0, 1, 1], [], []>} : vector<1x32xf32>, vector<32x32xf32>, vector<1x32xf32> -> vector<1x32xf32>
    %101 = arith.addf %97, %100 : vector<1x32xf32>
    %c3 = arith.constant 3 : index
    %c0_119 = arith.constant 0 : index
    %102 = tpu.strided_load %arg20[%c3, %c0_119] {strides = array<i32: 4, 1>} : memref<4x32xf32, #tpu.memory_space<vmem>>, vector<1x32xf32>
    %c96 = arith.constant 96 : index
    %c0_120 = arith.constant 0 : index
    %103 = vector.load %arg10[%c96, %c0_120] : memref<128x32xf32, #tpu.memory_space<vmem>>, vector<32x32xf32>
    %cst_121 = arith.constant dense<0.000000e+00> : vector<1x32xf32>
    %104 = tpu.matmul %102, %103, %cst_121 {dimension_numbers = #tpu.dot_dimension_numbers<[1], [0], [0], [1], [0, 0, 1, 1], [], []>} : vector<1x32xf32>, vector<32x32xf32>, vector<1x32xf32> -> vector<1x32xf32>
    %105 = arith.addf %101, %104 : vector<1x32xf32>
    %cst_122 = arith.constant 0.000000e+00 : f32
    %106 = vector.broadcast %cst_122 : f32 to vector<1x32xf32>
    %107 = arith.maximumf %105, %106 : vector<1x32xf32>
    %c0_123 = arith.constant 0 : index
    %c0_124 = arith.constant 0 : index
    %108 = vector.load %arg12[%c0_123, %c0_124] : memref<32x10xf32, #tpu.memory_space<vmem>>, vector<32x10xf32>
    %cst_125 = arith.constant dense<0.000000e+00> : vector<1x10xf32>
    %109 = tpu.matmul %107, %108, %cst_125 {dimension_numbers = #tpu.dot_dimension_numbers<[1], [0], [0], [1], [0, 0, 1, 1], [], []>} : vector<1x32xf32>, vector<32x10xf32>, vector<1x10xf32> -> vector<1x10xf32>
    %c0_126 = arith.constant 0 : index
    %c0_127 = arith.constant 0 : index
    %110 = vector.load %arg13[%c0_126, %c0_127] : memref<1x10xf32, #tpu.memory_space<vmem>>, vector<1x10xf32>
    %111 = arith.addf %109, %110 : vector<1x10xf32>
    %c0_128 = arith.constant 0 : index
    %c0_129 = arith.constant 0 : index
    %c0_130 = arith.constant 0 : index
    %112 = vector.load %arg14[%c0_128, %c0_129, %c0_130] : memref<1x1x10xf32, #tpu.memory_space<vmem>>, vector<1x1x10xf32>
    %113 = vector.shape_cast %112 : vector<1x1x10xf32> to vector<1x10xf32>
    %114 = vector.shape_cast %111 : vector<1x10xf32> to vector<1x1x10xf32>
    tpu.vector_store %arg14[%c0_128, %c0_129, %c0_130], %114 {strides = array<i32>} : memref<1x1x10xf32, #tpu.memory_space<vmem>>, vector<1x1x10xf32>,
    return
  }
  func.func @transform_0(%arg0: i32) -> (i32, i32, i32) {
    %c0_i32 = arith.constant 0 : i32
    %c0_i32_0 = arith.constant 0 : i32
    %c0_i32_1 = arith.constant 0 : i32
    return %arg0, %c0_i32, %c0_i32_0 : i32, i32, i32
  }
  func.func @transform_1(%arg0: i32) -> (i32, i32, i32) {
    %c0_i32 = arith.constant 0 : i32
    %c0_i32_0 = arith.constant 0 : i32
    %c0_i32_1 = arith.constant 0 : i32
    %c0_i32_2 = arith.constant 0 : i32
    return %c0_i32, %c0_i32_0, %c0_i32_1 : i32, i32, i32
  }
  func.func @transform_2(%arg0: i32) -> (i32, i32) {
    %c0_i32 = arith.constant 0 : i32
    %c0_i32_0 = arith.constant 0 : i32
    %c0_i32_1 = arith.constant 0 : i32
    return %c0_i32, %c0_i32_0 : i32, i32
  }
  func.func @transform_3(%arg0: i32) -> (i32, i32, i32) {
    %c0_i32 = arith.constant 0 : i32
    %c0_i32_0 = arith.constant 0 : i32
    %c0_i32_1 = arith.constant 0 : i32
    %c0_i32_2 = arith.constant 0 : i32
    return %c0_i32, %c0_i32_0, %c0_i32_1 : i32, i32, i32
  }
  func.func @transform_4(%arg0: i32) -> (i32, i32) {
    %c0_i32 = arith.constant 0 : i32
    %c0_i32_0 = arith.constant 0 : i32
    %c0_i32_1 = arith.constant 0 : i32
    return %c0_i32, %c0_i32_0 : i32, i32
  }
  func.func @transform_5(%arg0: i32) -> (i32, i32) {
    %c0_i32 = arith.constant 0 : i32
    %c0_i32_0 = arith.constant 0 : i32
    %c0_i32_1 = arith.constant 0 : i32
    return %c0_i32, %c0_i32_0 : i32, i32
  }
  func.func @transform_6(%arg0: i32) -> (i32, i32, i32) {
    %c0_i32 = arith.constant 0 : i32
    %c0_i32_0 = arith.constant 0 : i32
    %c0_i32_1 = arith.constant 0 : i32
    %c0_i32_2 = arith.constant 0 : i32
    return %c0_i32, %c0_i32_0, %c0_i32_1 : i32, i32, i32
  }
  func.func @transform_7(%arg0: i32) -> (i32, i32) {
    %c0_i32 = arith.constant 0 : i32
    %c0_i32_0 = arith.constant 0 : i32
    %c0_i32_1 = arith.constant 0 : i32
    return %c0_i32, %c0_i32_0 : i32, i32
  }
  func.func @transform_8(%arg0: i32) -> (i32, i32) {
    %c0_i32 = arith.constant 0 : i32
    %c0_i32_0 = arith.constant 0 : i32
    %c0_i32_1 = arith.constant 0 : i32
    return %c0_i32, %c0_i32_0 : i32, i32
  }
  func.func @transform_9(%arg0: i32) -> (i32, i32) {
    %c0_i32 = arith.constant 0 : i32
    %c0_i32_0 = arith.constant 0 : i32
    %c0_i32_1 = arith.constant 0 : i32
    return %c0_i32, %c0_i32_0 : i32, i32
  }
  func.func @transform_10(%arg0: i32) -> (i32, i32) {
    %c0_i32 = arith.constant 0 : i32
    %c0_i32_0 = arith.constant 0 : i32
    %c0_i32_1 = arith.constant 0 : i32
    return %c0_i32, %c0_i32_0 : i32, i32
  }
  func.func @transform_11(%arg0: i32) -> (i32, i32) {
    %c0_i32 = arith.constant 0 : i32
    %c0_i32_0 = arith.constant 0 : i32
    %c0_i32_1 = arith.constant 0 : i32
    return %c0_i32, %c0_i32_0 : i32, i32
  }
  func.func @transform_12(%arg0: i32) -> (i32, i32) {
    %c0_i32 = arith.constant 0 : i32
    %c0_i32_0 = arith.constant 0 : i32
    %c0_i32_1 = arith.constant 0 : i32
    return %c0_i32, %c0_i32_0 : i32, i32
  }
  func.func @transform_13(%arg0: i32) -> (i32, i32, i32) {
    %c0_i32 = arith.constant 0 : i32
    %c0_i32_0 = arith.constant 0 : i32
    %c0_i32_1 = arith.constant 0 : i32
    return %arg0, %c0_i32, %c0_i32_0 : i32, i32, i32
  }
}

</mosaic_0001>

<bundles_post_ra>
// kernel: tiny_vgg_forward.1
= control target key start
LH: loop header
LB: loop body
LE: loop exit
PB: predicated region body
PF: predicated region fallthrough
CT: control target
= control target key end

     0   :  { %18 = vsyncpa [#allocation9], 0  ;;  %s3311_s0 = inlined_call_operand.vmem [shape: f32[2,17,68], index: 0, kind: input, shape index: {}]   ;;  %s3312_s1 = inlined_call_operand.vmem [shape: f32[3,68,170], index: 1, kind: input, shape index: {}]   ;;  %s3313_s2 = inlined_call_operand.vmem [shape: f32[1,170], index: 2, kind: input, shape index: {}]   ;;  %s3314_s3 = inlined_call_operand.vmem [shape: f32[3,170,160], index: 3, kind: input, shape index: {}]   ;;  %s3315_s4 = inlined_call_operand.vmem [shape: f32[1,160], index: 4, kind: input, shape index: {}]   ;;  %s3316_s5 = inlined_call_operand.vmem [shape: f32[320,90], index: 5, kind: input, shape index: {}]   ;;  %s3317_s6 = inlined_call_operand.vmem [shape: f32[3,90,64], index: 6, kind: input, shape index: {}]   ;;  %s3318_s7 = inlined_call_operand.vmem [shape: f32[1,64], index: 7, kind: input, shape index: {}]   ;;  %s3319_s8 = inlined_call_operand.vmem [shape: f32[128,32], index: 8, kind: input, shape index: {}]   ;;  %s3320_s9 = inlined_call_operand.vmem [shape: f32[128,32], index: 9, kind: input, shape index: {}]   ;;  %s3321_s10 = inlined_call_operand.vmem [shape: f32[1,32], index: 10, kind: input, shape index: {}]   ;;  %s3322_s11 = inlined_call_operand.vmem [shape: f32[32,10], index: 11, kind: input, shape index: {}]   ;;  %s3323_s12 = inlined_call_operand.vmem [shape: f32[1,10], index: 12, kind: input, shape index: {}]   ;;  %s3324_s13 = inlined_call_operand.hbm [shape: f32[2,1,10], index: 13, kind: output, shape index: {}]  }
   0x1   :  { %20 = vsyncpa [#allocation9 + $0x1], 0  ;;  %s2195_s25 = smov 0   ;;  %s2197_s26 = smov 0  }
   0x2   :  { %s2199_s27 = smov 0   ;;  %s2201_s28 = smov 0  }
   0x3 LB: > { %3329 = sst [smem:[#allocation11_spill]] %s2118_s27  ;;  %s2216_s29 = sadd.s32 4294967295, %s2122_s28   ;;  %s2122_s28 = sphi %s2201_s28, %s3336_s28   ;;  %s2118_s27 = sphi %s2199_s27, %s3338_s27   ;;  %s2114_s26 = sphi %s2197_s26, %s3340_s26   ;;  %s2110_s25 = sphi %s2195_s25, %s3339_s25  }
   0x4   : > { %s1810_s30 = sadd.s32 4294967294, %s2122_s28   ;;  %s2220_s14 = sadd.s32 1, %s2122_s28  }
   0x5   : > { %3330 = sst [smem:[#allocation12_spill]] %s2220_s14  ;;  %s311_s15 = sadd.s32 1, %s2118_s27 }
   0x6   : > { %s308_s16 = ssub.s32 %s2122_s28, %s2220_s14  ;;  %p321_p0 = scmp.ne.s32.totalorder %s2118_s27, %s2114_s26 }
   0x7   : > { %p309_p1 = scmp.eq.s32.totalorder %s308_s16, 0  ;;  %p322_p2 = scmp.eq.s32.totalorder %s2216_s29, 1 }
   0x8   : > { %p327_p3 = scmp.ne.s32.totalorder %s2114_s26, %s2110_s25  ;;  %p328_p4 = scmp.eq.s32.totalorder %s1810_s30, 1 }
   0x9   : > { %s2231_s17 = scalar_select %p309_p1, %s2118_s27, %s311_s15  }
   0xa   : > { %p2233_p5 = por %p322_p2, %p321_p0  ;;  %p2237_p6 = por %p328_p4, %p327_p3 }
   0xb   : > { %3331 = sst [smem:[#allocation13_spill]] %s2231_s17  ;;  %p1813_p7 = scmp.ge.s32.totalorder %s2122_s28, 1 }
   0xc   : > { %s3333_s19 = scalar_select %p2237_p6, 1, 0 }
   0xd   : > { %p390_p8 = scmp.lt.s32.totalorder %s2122_s28, 3 }
   0xe   : > { %3334 = sst [smem:[#allocation14_spill]] %s3333_s19 }
   0xf   : > { %p391_p9 = pnand %p1813_p7, %p390_p8 }
  0x10   : > { %p433_p10 = scmp.lt.s32.totalorder (!%p391_p9), %s2216_s29, 1  ;;  %s1751_s19 = scalar_lea.hbm (!%p391_p9), %s3324_s13, %s2216_s29 }
  0x11   : > { %394 = sbr.rel (%p391_p9) target bundleno = 1126 (0x466), region = 72  ;;  %s1755_s23 = sshll.u32 (!%p391_p9), %s1751_s19, 4  ;;  %s1756_s23 = int_to_ptr.hbm [resolvable:$true] %s1755_s23 }
  0x12   : > { %s2074_s24 = sshra.s32 (!%p391_p9), %s1756_s23, 4  ;;  %s2080_s14 = scalar_lea.hbm (!%p391_p9), %s3324_s13, 2  ;;  %s2075_s24 = int_to_ptr.hbm [resolvable:$true] %s2074_s24 }
  0x13   : > { %p2081_p0 = scmp.lt.s32.totalorder (!%p391_p9), %s2075_s24, %s3324_s13 }
  0x16   : > { %v1831_v0 = vld [vmem:[%s3312_s1 + $0x110] sm:$0xf]  ;;  %vm494_vm0 = vcmask 1043456   ;;  %v1832_v1 = vld [vmem:[%s3312_s1 + $0x118] sm:$0xf]  ;;  %v1829_v2 = vld [vmem:[%s3312_s1 + $0x100] sm:$0xff] }
  0x17   : > { %1833 = vmatpush.msk.msra.mxu0 %vm494_vm0, %v1831_v0  ;;  %1836 = vmatpush.msk.msra.mxu1 %vm494_vm0, %v1832_v1  ;;  %v465_v3 = vld [vmem:[%s3312_s1 + $0x80] sm:$0xf]  ;;  %v1830_v4 = vld [vmem:[%s3312_s1 + $0x108] sm:$0xff]  ;;  %v463_v5 = vld [vmem:[%s3312_s1 + $0x70] sm:$0xff]  ;;  %vm438_vm1 = vcmask 548864   ;;  %s434_s17 = scalar_select %p433_p10, %s2216_s29, 1 }
  0x18   : > { %1839 = vmatpush.msk.msra.mxu2 %vm494_vm0, %v465_v3  ;;  %v1827_v6 = vld [vmem:[%s3312_s1 + $0xf0] sm:$0xff]  ;;  %v1828_v7 = vld [vmem:[%s3312_s1 + $0xf8] sm:$0xff]  ;;  %v461_v8 = vld [vmem:[%s3312_s1 + $0x60] sm:$0xff]  ;;  %v2124_v9 = vmov 0.0   ;;  %vm443_vm2 = vcmask 556032   ;;  %vm857_vm3 = vcmask 1041408  }
  0x19   : > { %509 = vmatpush.msra.mxu0 %v1829_v2  ;;  %532 = vmatpush.msra.mxu1 %v1830_v4  ;;  %439 = vst.msk [vmem:[#allocation2] sm:$0x1] %vm438_vm1, %v2124_v9  ;;  %v1825_v10 = vld [vmem:[%s3312_s1 + $0xe0] sm:$0xff]  ;;  %v1826_v11 = vld [vmem:[%s3312_s1 + $0xe8] sm:$0xff]  ;;  %v459_v12 = vld [vmem:[%s3312_s1 + $0x50] sm:$0xff]  ;;  %s2018_s16 = smul.u32 24, %s434_s17 }
  0x1a   : > { %567 = vmatpush.msra.mxu2 %v463_v5  ;;  %v466_v13 = vld [vmem:[%s3312_s1 + $0x88] sm:$0xf]  ;;  %v1823_v14 = vld [vmem:[%s3312_s1 + $0xd0] sm:$0xff]  ;;  %v1824_v15 = vld [vmem:[%s3312_s1 + $0xd8] sm:$0xff]  ;;  %vm720_vm5 = vcmask 343041   ;;  %vm706_vm6 = vcmask 1040384  }
  0x1b   : > { %510 = vmatpush.msra.mxu0 %v1827_v6  ;;  %533 = vmatpush.msra.mxu1 %v1828_v7  ;;  %v464_v16 = vld [vmem:[%s3312_s1 + $0x78] sm:$0xff]  ;;  %v457_v17 = vld [vmem:[%s3312_s1 + $0x40] sm:$0xff]  ;;  %v462_v18 = vld [vmem:[%s3312_s1 + $0x68] sm:$0xff]  ;;  %s2308_s15 = scalar_lea.vmem %s3311_s0, %s2018_s16  ;;  %vm723_vm7 = vcmask 343040   ;;  %vm726_vm8 = vcmask 335872   ;;  %vm840_vm9 = vcmask 1046528  }
  0x1c   : > { %568 = vmatpush.msra.mxu2 %v461_v8  ;;  %1842 = vmatpush.msk.msra.mxu3 %vm494_vm0, %v466_v13  ;;  %v1821_v19 = vld [vmem:[%s3312_s1 + $0xc0] sm:$0xff]  ;;  %v1822_v20 = vld [vmem:[%s3312_s1 + $0xc8] sm:$0xff]  ;;  %v455_v21 = vld [vmem:[%s3312_s1 + $0x30] sm:$0xff]  ;;  %vm1112_vm10 = vcmask 1045504   ;;  %vm1265_vm11 = vcmask 261120   ;;  %vm1389_vm12 = vcmask 729088  }
  0x1d   : > { %511 = vmatpush.msra.mxu0 %v1825_v10  ;;  %534 = vmatpush.msra.mxu1 %v1826_v11  ;;  %v460_v22 = vld [vmem:[%s3312_s1 + $0x58] sm:$0xff]  ;;  %v1819_v23 = vld [vmem:[%s3312_s1 + $0xb0] sm:$0xff]  ;;  %v440_v25 = vld [vmem:[%s2308_s15] sm:$0xff]  ;;  %1390 = vst.msk [vmem:[#allocation5] sm:$0x1] %vm1389_vm12, %v2124_v9  ;;  %vm1386_vm13 = vcmask 736256  }
  0x1e   : > { %569 = vmatpush.msra.mxu2 %v459_v12  ;;  %590 = vmatpush.msra.mxu3 %v464_v16  ;;  %v1820_v24 = vld [vmem:[%s3312_s1 + $0xb8] sm:$0xff]  ;;  %v453_v26 = vld [vmem:[%s3312_s1 + $0x20] sm:$0xff]  ;;  %444 = vst.msk [vmem:[#allocation2 + $0x1] sm:$0xff] %vm443_vm2, %v440_v25  ;;  %v458_v27 = vld [vmem:[%s3312_s1 + $0x48] sm:$0xff]  ;;  %vm1531_vm14 = vcmask 523264   ;;  %vm1589_vm15 = vcmask 257024  }
  0x1f   : > { %512 = vmatpush.msra.mxu0 %v1823_v14  ;;  %535 = vmatpush.msra.mxu1 %v1824_v15  ;;  %v1817_v28 = vld [vmem:[%s3312_s1 + $0xa0] sm:$0xff]  ;;  %v1818_v29 = vld [vmem:[%s3312_s1 + $0xa8] sm:$0xff]  ;;  %v451_v30 = vld [vmem:[%s3312_s1 + $0x10] sm:$0xff]  ;;  %1396 = vst.msk [vmem:[#allocation5 + $0x9] sm:$0x1] %vm1389_vm12, %v2124_v9  ;;  %s431_s17 = sand.u32 1, %s2114_s26  }
  0x20   : > { %570 = vmatpush.msra.mxu2 %v457_v17  ;;  %591 = vmatpush.msra.mxu3 %v462_v18  ;;  %v456_v31 = vld [vmem:[%s3312_s1 + $0x38] sm:$0xff]  ;;  %v1815_v32 = vld [vmem:[%s3312_s1 + $0x90] sm:$0xff]  ;;  %v441_v34 = vld [vmem:[%s2308_s15 + $0x8] sm:$0xff]  ;;  %s1743_s27 = scalar_lea.sflag [#allocation9], %s431_s17  ;;  %s2076_s16 = scalar_lea.hbm %s2075_s24, 1 }
  0x21   : > { %513 = vmatpush.msra.mxu0 %v1821_v19  ;;  %536 = vmatpush.msra.mxu1 %v1822_v20  ;;  %v1816_v33 = vld [vmem:[%s3312_s1 + $0x98] sm:$0xff]  ;;  %v449_v35 = vld [vmem:[%s3312_s1] sm:$0xff]  ;;  %445 = vst.msk [vmem:[#allocation2 + $0x9] sm:$0xff] %vm443_vm2, %v441_v34  ;;  %v1862_v37 = vld [vmem:[%s3312_s1 + $0x1a8] sm:$0xf]  ;;  %p2077_p11 = scmp.ne.s32.totalorder %s2075_s24, %s2076_s16  ;;  %p2082_p1 = scmp.lt.s32.totalorder %s2080_s14, %s2076_s16 }
  0x22   : > { %571 = vmatpush.msra.mxu2 %v455_v21  ;;  %592 = vmatpush.msra.mxu3 %v460_v22  ;;  %v1861_v36 = vld [vmem:[%s3312_s1 + $0x1a0] sm:$0xf]  ;;  %v1859_v38 = vld [vmem:[%s3312_s1 + $0x190] sm:$0xff]  ;;  %v1860_v41 = vld [vmem:[%s3312_s1 + $0x198] sm:$0xff] }
  0x23   : > { %514 = vmatpush.msra.mxu0 %v1819_v23  ;;  %537 = vmatpush.msra.mxu1 %v1820_v24  ;;  %v454_v42 = vld [vmem:[%s3312_s1 + $0x28] sm:$0xff]  ;;  %v442_v43 = vld [vmem:[%s2308_s15 + $0x10] sm:$0x1]  ;;  %v1857_v44 = vld [vmem:[%s3312_s1 + $0x180] sm:$0xff]  ;;  %s432_s15 = scalar_lea.vmem [#allocation8], %s431_s17  ;;  %p2078_p12 = pnand %p2077_p11, %p2233_p5 }
  0x24   : > { %572 = vmatpush.msra.mxu2 %v453_v26  ;;  %593 = vmatpush.msra.mxu3 %v458_v27  ;;  %v1858_v45 = vld [vmem:[%s3312_s1 + $0x188] sm:$0xff]  ;;  %446 = vst.msk [vmem:[#allocation2 + $0x11] sm:$0x1] %vm438_vm1, %v442_v43  ;;  %v452_v46 = vld [vmem:[%s3312_s1 + $0x18] sm:$0xff]  ;;  %v1855_v47 = vld [vmem:[%s3312_s1 + $0x170] sm:$0xff]  ;;  %s1753_s22 = sshll.u32 %s432_s15, 4  ;;  %p2083_p2 = por %p2082_p1, %p2081_p0  ;;  %s1754_s22 = int_to_ptr.vmem [resolvable:$true] %s1753_s22 }
  0x25   : > { %515 = vmatpush.msra.mxu0 %v1817_v28  ;;  %538 = vmatpush.msra.mxu1 %v1818_v29  ;;  %v447_v39 = vld [vmem:[#allocation2] sm:$0xff]  ;;  %v1856_v48 = vld [vmem:[%s3312_s1 + $0x178] sm:$0xff]  ;;  %v450_v49 = vld [vmem:[%s3312_s1 + $0x8] sm:$0xff]  ;;  %p2079_p13 = pneg %p2078_p12 }
  0x26   : > { %573 = vmatpush.msra.mxu2 %v451_v30  ;;  %594 = vmatpush.msra.mxu3 %v456_v31  ;;  %v467_v40 = vld [vmem:[#allocation2 + $0x1] sm:$0xff]  ;;  %v1851_v54 = vld [vmem:[%s3312_s1 + $0x150] sm:$0xff]  ;;  %v1852_v55 = vld [vmem:[%s3312_s1 + $0x158] sm:$0xff] }
  0x27   : > { %516 = vmatpush.msra.mxu0 %v1815_v32  ;;  %539 = vmatpush.msra.mxu1 %v1816_v33  ;;  %v1853_v51 = vld [vmem:[%s3312_s1 + $0x160] sm:$0xff]  ;;  %v1854_v52 = vld [vmem:[%s3312_s1 + $0x168] sm:$0xff]  ;;  %v1847_v58 = vld [vmem:[%s3312_s1 + $0x130] sm:$0xff]  ;;  %p2084_p3 = pnand %p2083_p2, %p2079_p13 }
  0x28   : > { %574 = vmatpush.msra.mxu2 %v449_v35  ;;  %1834 = vmatmul.msk.f32.vlgmr.msra.gmra.mxu0 %vm443_vm2, %v467_v40  ;;  %v448_v50 = vld [vmem:[#allocation2 + $0x8] sm:$0xff]  ;;  %v1849_v56 = vld [vmem:[%s3312_s1 + $0x140] sm:$0xff]  ;;  %v1848_v59 = vld [vmem:[%s3312_s1 + $0x138] sm:$0xff] }
  0x29   : > { %1863 = vmatpush.msk.msrb.mxu0 %vm494_vm0, %v1861_v36  ;;  %1840 = vmatmul.msk.f32.vlgmr.msra.gmra.mxu2 %vm443_vm2, %v447_v39  ;;  %v468_v53 = vld [vmem:[#allocation2 + $0x9] sm:$0xff]  ;;  %v1845_v60 = vld [vmem:[%s3312_s1 + $0x120] sm:$0xff]  ;;  %v1900_v21 = vld [vmem:[%s3314_s3 + $0x258] sm:$0xff] }
  0x2a   : > { %1866 = vmatpush.msk.msrb.mxu1 %vm494_vm0, %v1862_v37  ;;  %595 = vmatpush.msra.mxu3 %v454_v42  ;;  %v1850_v57 = vld [vmem:[%s3312_s1 + $0x148] sm:$0xff]  ;;  %v771_v0 = vld [vmem:[%s3314_s3 + $0xf0] sm:$0xff]  ;;  %v769_v2 = vld [vmem:[%s3314_s3 + $0xe0] sm:$0xff]  ;;  %vm1740_vm0 = vcmask 73728  }
  0x2b   : > { %1837 = vmatmul.msk.f32.vlgmr.msra.gmra.mxu1 %vm443_vm2, %v467_v40  ;;  %646 = vmatpush.msrb.mxu0 %v1859_v38  ;;  %v1846_v61 = vld [vmem:[%s3312_s1 + $0x128] sm:$0xff]  ;;  %v1911_v1 = vld [vmem:[%s3314_s3 + $0x2b0] sm:$0x3]  ;;  %v1897_v4 = vld [vmem:[%s3314_s3 + $0x240] sm:$0xff]  ;;  %v728_v38 = vlaneseq }
  0x2c   : > { %669 = vmatpush.msrb.mxu1 %v1860_v41  ;;  %596 = vmatpush.msra.mxu3 %v452_v46  ;;  %v605_v62 = vld [vmem:[#allocation2 + $0x2] sm:$0xff]  ;;  %v606_v63 = vld [vmem:[#allocation2 + $0xa] sm:$0xff]  ;;  %v1896_v26 = vld [vmem:[%s3314_s3 + $0x238] sm:$0xff] }
  0x2d   : > { %647 = vmatpush.msrb.mxu0 %v1857_v44  ;;  %v1899_v3 = vld [vmem:[%s3314_s3 + $0x250] sm:$0xff]  ;;  %v1909_v5 = vld [vmem:[%s3314_s3 + $0x2a0] sm:$0xff]  ;;  %v1898_v24 = vld [vmem:[%s3314_s3 + $0x248] sm:$0xff]  ;;  %vm730_vm4 = vcmp.lt.s32.totalorder %v728_v38, 170 }
  0x2e   : > { %670 = vmatpush.msrb.mxu1 %v1858_v45  ;;  %597 = vmatpush.msra.mxu3 %v450_v49  ;;  %v767_v6 = vld [vmem:[%s3314_s3 + $0xd0] sm:$0xff]  ;;  %v1893_v8 = vld [vmem:[%s3314_s3 + $0x220] sm:$0xff]  ;;  %v1912_v27 = vld [vmem:[%s3314_s3 + $0x2b8] sm:$0x3] }
  0x2f   : > { %648 = vmatpush.msrb.mxu0 %v1855_v47  ;;  %1843 = vmatmul.msk.f32.vlgmr.msra.gmra.mxu3 %vm443_vm2, %v447_v39  ;;  %v1895_v7 = vld [vmem:[%s3314_s3 + $0x230] sm:$0xff]  ;;  %v765_v11 = vld [vmem:[%s3314_s3 + $0xc0] sm:$0xff]  ;;  %v1894_v30 = vld [vmem:[%s3314_s3 + $0x228] sm:$0xff]  ;;  %732 = vst.msk [vmem:[#allocation3] ss:$8 sm:$0x3] %vm730_vm4, %v2124_v9 }
  0x30   : > { %671 = vmatpush.msrb.mxu1 %v1856_v48  ;;  %1835 = vmatmul.msk.f32.gmra.mxu0 %vm443_vm2, %v468_v53  ;;  %v1907_v10 = vld [vmem:[%s3314_s3 + $0x290] sm:$0xff]  ;;  %v1905_v12 = vld [vmem:[%s3314_s3 + $0x280] sm:$0xff]  ;;  %v1910_v31 = vld [vmem:[%s3314_s3 + $0x2a8] sm:$0xff]  ;;  %735 = vst.msk [vmem:[#allocation3 + $0x21] ss:$8 sm:$0x3] %vm730_vm4, %v2124_v9 }
  0x31   : > { %1841 = vmatmul.msk.f32.gmra.mxu2 %vm443_vm2, %v448_v50  ;;  %649 = vmatpush.msrb.mxu0 %v1853_v51  ;;  %v763_v13 = vld [vmem:[%s3314_s3 + $0xb0] sm:$0xff]  ;;  %v761_v15 = vld [vmem:[%s3314_s3 + $0xa0] sm:$0xff]  ;;  %v1892_v34 = vld [vmem:[%s3314_s3 + $0x218] sm:$0xff] }
  0x32   : > { %672 = vmatpush.msrb.mxu1 %v1854_v52  ;;  %1913 = vmatpush.msk.msrb.mxu3 %vm857_vm3, %v1911_v1  ;;  %v1903_v14 = vld [vmem:[%s3314_s3 + $0x270] sm:$0xff]  ;;  %v1889_v17 = vld [vmem:[%s3314_s3 + $0x200] sm:$0xff]  ;;  %v1908_v35 = vld [vmem:[%s3314_s3 + $0x298] sm:$0xff] }
  0x33   : > { %1838 = vmatmul.msk.f32.gmra.mxu1 %vm443_vm2, %v468_v53  ;;  %650 = vmatpush.msrb.mxu0 %v1851_v54  ;;  %v1891_v16 = vld [vmem:[%s3314_s3 + $0x210] sm:$0xff]  ;;  %v1901_v19 = vld [vmem:[%s3314_s3 + $0x260] sm:$0xff]  ;;  %v1890_v40 = vld [vmem:[%s3314_s3 + $0x208] sm:$0xff] }
  0x34   : > { %673 = vmatpush.msrb.mxu1 %v1852_v55  ;;  %864 = vmatpush.msrb.mxu2 %v1899_v3  ;;  %v1887_v18 = vld [vmem:[%s3314_s3 + $0x1f0] sm:$0xff]  ;;  %v1885_v22 = vld [vmem:[%s3314_s3 + $0x1e0] sm:$0xff]  ;;  %v1906_v41 = vld [vmem:[%s3314_s3 + $0x288] sm:$0xff] }
  0x35   : > { %651 = vmatpush.msrb.mxu0 %v1849_v56  ;;  %898 = vmatpush.msrb.mxu3 %v1909_v5  ;;  %v759_v20 = vld [vmem:[%s3314_s3 + $0x90] sm:$0xff]  ;;  %v757_v23 = vld [vmem:[%s3314_s3 + $0x80] sm:$0xff]  ;;  %v1888_v44 = vld [vmem:[%s3314_s3 + $0x1f8] sm:$0xff] }
  0x36   : > { %674 = vmatpush.msrb.mxu1 %v1850_v57  ;;  %865 = vmatpush.msrb.mxu2 %v1897_v4  ;;  %v755_v25 = vld [vmem:[%s3314_s3 + $0x70] sm:$0xff]  ;;  %v753_v29 = vld [vmem:[%s3314_s3 + $0x60] sm:$0xff]  ;;  %v1904_v45 = vld [vmem:[%s3314_s3 + $0x278] sm:$0xff] }
  0x37   : > { %652 = vmatpush.msrb.mxu0 %v1847_v58  ;;  %1844 = vmatmul.msk.f32.gmra.mxu3 %vm443_vm2, %v448_v50  ;;  %v1883_v28 = vld [vmem:[%s3314_s3 + $0x1d0] sm:$0xff]  ;;  %v1881_v32 = vld [vmem:[%s3314_s3 + $0x1c0] sm:$0xff]  ;;  %v1886_v50 = vld [vmem:[%s3314_s3 + $0x1e8] sm:$0xff] }
  0x38   : > { %675 = vmatpush.msrb.mxu1 %v1848_v59  ;;  %866 = vmatpush.msrb.mxu2 %v1895_v7  ;;  %v751_v33 = vld [vmem:[%s3314_s3 + $0x50] sm:$0xff]  ;;  %v1877_v37 = vld [vmem:[%s3314_s3 + $0x1a0] sm:$0xff]  ;;  %v1902_v51 = vld [vmem:[%s3314_s3 + $0x268] sm:$0xff] }
  0x39   : > { %653 = vmatpush.msrb.mxu0 %v1845_v60  ;;  %899 = vmatpush.msrb.mxu3 %v1907_v10  ;;  %v1879_v36 = vld [vmem:[%s3314_s3 + $0x1b0] sm:$0xff]  ;;  %v749_v39 = vld [vmem:[%s3314_s3 + $0x40] sm:$0xff]  ;;  %v772_v54 = vld [vmem:[%s3314_s3 + $0xf8] sm:$0xff] }
  0x3a   : > { %676 = vmatpush.msrb.mxu1 %v1846_v61  ;;  %1864 = vmatmul.msk.f32.vlgmr.msrb.gmra.mxu0 %vm443_vm2, %v605_v62  ;;  %v1875_v42 = vld [vmem:[%s3314_s3 + $0x190] sm:$0xff]  ;;  %v745_v46 = vld [vmem:[%s3314_s3 + $0x20] sm:$0xff]  ;;  %v1884_v55 = vld [vmem:[%s3314_s3 + $0x1d8] sm:$0xff] }
  0x3b   : > { %1867 = vmatmul.msk.f32.vlgmr.msrb.gmra.mxu1 %vm443_vm2, %v605_v62  ;;  %867 = vmatpush.msrb.mxu2 %v1893_v8  ;;  %v747_v43 = vld [vmem:[%s3314_s3 + $0x30] sm:$0xff]  ;;  %v1873_v47 = vld [vmem:[%s3314_s3 + $0x180] sm:$0xff]  ;;  %v770_v58 = vld [vmem:[%s3314_s3 + $0xe8] sm:$0xff] }
  0x3c   : > { %967 = vmatpush.msra.mxu1 %v771_v0  ;;  %900 = vmatpush.msrb.mxu3 %v1905_v12  ;;  %v1871_v52 = vld [vmem:[%s3314_s3 + $0x170] sm:$0xff]  ;;  %v1869_v56 = vld [vmem:[%s3314_s3 + $0x160] sm:$0xff]  ;;  %v1882_v60 = vld [vmem:[%s3314_s3 + $0x1c8] sm:$0xff] }
  0x3d   : > { %868 = vmatpush.msrb.mxu2 %v1891_v16  ;;  %1916 = vmatpush.msk.msra.mxu0 %vm857_vm3, %v1912_v27  ;;  %v743_v53 = vld [vmem:[%s3314_s3 + $0x10] sm:$0xff]  ;;  %v741_v57 = vld [vmem:[%s3314_s3] sm:$0xff]  ;;  %v768_v61 = vld [vmem:[%s3314_s3 + $0xd8] sm:$0xff] }
  0x3e   : > { %968 = vmatpush.msra.mxu1 %v769_v2  ;;  %901 = vmatpush.msrb.mxu3 %v1903_v14  ;;  %v783_v59 = vld [vmem:[%s3314_s3 + $0x150] sm:$0x3]  ;;  %v1880_v62 = vld [vmem:[%s3314_s3 + $0x1b8] sm:$0xff]  ;;  %v1878_v0 = vld [vmem:[%s3314_s3 + $0x1a8] sm:$0xff] }
  0x3f   : > { %869 = vmatpush.msrb.mxu2 %v1889_v17  ;;  %944 = vmatpush.msra.mxu0 %v1910_v31  ;;  %v764_v1 = vld [vmem:[%s3314_s3 + $0xb8] sm:$0xff]  ;;  %v1967_v3 = vld [vmem:[%s3314_s3 + $0x410] sm:$0x3]  ;;  %v1965_v5 = vld [vmem:[%s3314_s3 + $0x400] sm:$0xff] }
  0x40   : > { %969 = vmatpush.msra.mxu1 %v767_v6  ;;  %902 = vmatpush.msrb.mxu3 %v1901_v19  ;;  %v1876_v2 = vld [vmem:[%s3314_s3 + $0x198] sm:$0xff]  ;;  %v781_v6 = vld [vmem:[%s3314_s3 + $0x140] sm:$0xff]  ;;  %v779_v7 = vld [vmem:[%s3314_s3 + $0x130] sm:$0xff] }
  0x41   : > { %870 = vmatpush.msrb.mxu2 %v1887_v18  ;;  %945 = vmatpush.msra.mxu0 %v1908_v35  ;;  %v762_v10 = vld [vmem:[%s3314_s3 + $0xa8] sm:$0xff]  ;;  %v1963_v12 = vld [vmem:[%s3314_s3 + $0x3f0] sm:$0xff]  ;;  %v1872_v16 = vld [vmem:[%s3314_s3 + $0x178] sm:$0xff] }
  0x42   : > { %1865 = vmatmul.msk.f32.gmra.mxu0 %vm443_vm2, %v606_v63  ;;  %970 = vmatpush.msra.mxu1 %v765_v11  ;;  %v1874_v11 = vld [vmem:[%s3314_s3 + $0x188] sm:$0xff]  ;;  %v775_v17 = vld [vmem:[%s3314_s3 + $0x110] sm:$0xff]  ;;  %v688_v18 = vld [vmem:[%s3313_s2] sm:$0x3] }
  0x43   : > { %1868 = vmatmul.msk.f32.gmra.mxu1 %vm443_vm2, %v606_v63  ;;  %910 = vmatpush.msra.mxu3 %v1900_v21  ;;  %v766_v63 = vld [vmem:[%s3314_s3 + $0xc8] sm:$0xff]  ;;  %v690_v27 = vperm.slane %v688_v18, 0  ;;  %v1979_v9 = vld [vmem:[%s3317_s6 + $0x60] sm:$0xff] }
  0x44   : > { %971 = vmatpush.msra.mxu1 %v763_v13  ;;  %871 = vmatpush.msrb.mxu2 %v1885_v22  ;;  %v777_v13 = vld [vmem:[%s3314_s3 + $0x120] sm:$0xff]  ;;  %v758_v19 = vld [vmem:[%s3314_s3 + $0x88] sm:$0xff] }
  0x45   : > { %911 = vmatpush.msra.mxu3 %v1898_v24  ;;  %946 = vmatpush.msra.mxu0 %v1906_v41  ;;  %v1870_v22 = vld [vmem:[%s3314_s3 + $0x168] sm:$0xff]  ;;  %v756_v24 = vld [vmem:[%s3314_s3 + $0x78] sm:$0xff] }
  0x46   : > { %972 = vmatpush.msra.mxu1 %v761_v15  ;;  %872 = vmatpush.msrb.mxu2 %v1883_v28  ;;  %v760_v15 = vld [vmem:[%s3314_s3 + $0x98] sm:$0xff]  ;;  %v1959_v28 = vld [vmem:[%s3314_s3 + $0x3d0] sm:$0xff]  ;;  %v754_v31 = vld [vmem:[%s3314_s3 + $0x68] sm:$0xff] }
  0x47   : > { %912 = vmatpush.msra.mxu3 %v1896_v26  ;;  %947 = vmatpush.msra.mxu0 %v1904_v45 }
  0x48   : > { %973 = vmatpush.msra.mxu1 %v759_v20  ;;  %873 = vmatpush.msrb.mxu2 %v1881_v32  ;;  %v773_v20 = vld [vmem:[%s3314_s3 + $0x100] sm:$0xff] }
  0x49   : > { %913 = vmatpush.msra.mxu3 %v1894_v30  ;;  %948 = vmatpush.msra.mxu0 %v1902_v51  ;;  %v691_v30 = vperm.slane %v688_v18, 1  ;;  %v1955_v18 = vld [vmem:[%s3314_s3 + $0x3b0] sm:$0xff] }
  0x4a   : > { %974 = vmatpush.msra.mxu1 %v757_v23  ;;  %874 = vmatpush.msrb.mxu2 %v1879_v36  ;;  %v1961_v23 = vld [vmem:[%s3314_s3 + $0x3e0] sm:$0xff]  ;;  %v752_v36 = vld [vmem:[%s3314_s3 + $0x58] sm:$0xff] }
  0x4b   : > { %914 = vmatpush.msra.mxu3 %v1892_v34  ;;  %1013 = vmatpush.msrb.mxu0 %v772_v54  ;;  %v1957_v34 = vld [vmem:[%s3314_s3 + $0x3c0] sm:$0xff]  ;;  %v744_v54 = vld [vmem:[%s3314_s3 + $0x18] sm:$0xff] }
  0x4c   : > { %975 = vmatpush.msra.mxu1 %v755_v25  ;;  %875 = vmatpush.msrb.mxu2 %v1877_v37 }
  0x4d   : > { %915 = vmatpush.msra.mxu3 %v1890_v40  ;;  %1014 = vmatpush.msrb.mxu0 %v770_v58  ;;  %v750_v40 = vld [vmem:[%s3314_s3 + $0x48] sm:$0xff] }
  0x4e   : > { %976 = vmatpush.msra.mxu1 %v753_v29  ;;  %876 = vmatpush.msrb.mxu2 %v1875_v42 }
  0x4f   : > { %916 = vmatpush.msra.mxu3 %v1888_v44  ;;  %1015 = vmatpush.msrb.mxu0 %v768_v61  ;;  %v748_v44 = vld [vmem:[%s3314_s3 + $0x38] sm:$0xff] }
  0x50   : > { %977 = vmatpush.msra.mxu1 %v751_v33  ;;  %877 = vmatpush.msrb.mxu2 %v1873_v47 }
  0x51   : > { %917 = vmatpush.msra.mxu3 %v1886_v50  ;;  %1016 = vmatpush.msrb.mxu0 %v766_v63  ;;  %v746_v50 = vld [vmem:[%s3314_s3 + $0x28] sm:$0xff] }
  0x52   : > { %978 = vmatpush.msra.mxu1 %v749_v39  ;;  %878 = vmatpush.msrb.mxu2 %v1871_v52 }
  0x53   : > { %918 = vmatpush.msra.mxu3 %v1884_v55  ;;  %1017 = vmatpush.msrb.mxu0 %v764_v1 }
  0x54   : > { %979 = vmatpush.msra.mxu1 %v747_v43  ;;  %879 = vmatpush.msrb.mxu2 %v1869_v56 }
  0x55   : > { %919 = vmatpush.msra.mxu3 %v1882_v60  ;;  %1018 = vmatpush.msrb.mxu0 %v762_v10 }
  0x56   : > { %980 = vmatpush.msra.mxu1 %v745_v46  ;;  %1919 = vmatpush.msk.msra.mxu2 %vm857_vm3, %v783_v59 }
  0x57   : > { %920 = vmatpush.msra.mxu3 %v1880_v62  ;;  %1019 = vmatpush.msrb.mxu0 %v760_v15 }
  0x58   : > { %981 = vmatpush.msra.mxu1 %v743_v53  ;;  %1001 = vmatpush.msra.mxu2 %v781_v6  ;;  %v782_v6 = vld [vmem:[%s3314_s3 + $0x148] sm:$0xff] }
  0x59   : > { %921 = vmatpush.msra.mxu3 %v1878_v0  ;;  %1020 = vmatpush.msrb.mxu0 %v758_v19 }
  0x5a   : > { %982 = vmatpush.msra.mxu1 %v741_v57  ;;  %1002 = vmatpush.msra.mxu2 %v779_v7  ;;  %v742_v57 = vld [vmem:[%s3314_s3 + $0x8] sm:$0xff]  ;;  %v780_v7 = vld [vmem:[%s3314_s3 + $0x138] sm:$0xff] }
  0x5b   : > { %922 = vmatpush.msra.mxu3 %v1876_v2  ;;  %1021 = vmatpush.msrb.mxu0 %v756_v24 }
  0x5c   : > { %1969 = vmatpush.msk.msrb.mxu1 %vm857_vm3, %v1967_v3  ;;  %1003 = vmatpush.msra.mxu2 %v777_v13 }
  0x5d   : > { %923 = vmatpush.msra.mxu3 %v1874_v11  ;;  %1022 = vmatpush.msrb.mxu0 %v754_v31 }
  0x5e   : > { %1169 = vmatpush.msrb.mxu1 %v1965_v5  ;;  %1004 = vmatpush.msra.mxu2 %v775_v17 }
  0x5f   : > { %924 = vmatpush.msra.mxu3 %v1872_v16  ;;  %1023 = vmatpush.msrb.mxu0 %v752_v36 }
  0x60   : > { %1170 = vmatpush.msrb.mxu1 %v1963_v12  ;;  %1005 = vmatpush.msra.mxu2 %v773_v20  ;;  %v778_v12 = vld [vmem:[%s3314_s3 + $0x128] sm:$0xff]  ;;  %v776_v20 = vld [vmem:[%s3314_s3 + $0x118] sm:$0xff] }
  0x61   : > { %925 = vmatpush.msra.mxu3 %v1870_v22  ;;  %1024 = vmatpush.msrb.mxu0 %v750_v40  ;;  %v1968_v22 = vld [vmem:[%s3314_s3 + $0x418] sm:$0x3]  ;;  %v1945_v40 = vld [vmem:[%s3314_s3 + $0x360] sm:$0xff] }
  0x62   : > { %1171 = vmatpush.msrb.mxu1 %v1961_v23  ;;  %v1953_v23 = vld [vmem:[%s3314_s3 + $0x3a0] sm:$0xff] }
  0x63   : > { %1025 = vmatpush.msrb.mxu0 %v748_v44 }
  0x64   : > { %1172 = vmatpush.msrb.mxu1 %v1959_v28  ;;  %v1951_v28 = vld [vmem:[%s3314_s3 + $0x390] sm:$0xff] }
  0x65   : > { %1026 = vmatpush.msrb.mxu0 %v746_v50  ;;  %v1937_v50 = vld [vmem:[%s3314_s3 + $0x320] sm:$0xff] }
  0x66   : > { %1173 = vmatpush.msrb.mxu1 %v1957_v34  ;;  %v1947_v34 = vld [vmem:[%s3314_s3 + $0x370] sm:$0xff] }
  0x67   : > { %1027 = vmatpush.msrb.mxu0 %v744_v54  ;;  %v1933_v54 = vld [vmem:[%s3314_s3 + $0x300] sm:$0xff] }
  0x69   : > { %1028 = vmatpush.msrb.mxu0 %v742_v57  ;;  %v1942_v57 = vld [vmem:[%s3314_s3 + $0x348] sm:$0xff] }
  0xa5   : > { %v2580_v48 = vpop.f32.mrf.mxu0 }
  0xa8   : > { %v2582_v49 = vpop.f32.mrf.mxu1 }
  0xac   : > { %v576_v14 = vpop.f32.mrf.mxu2 }
  0xad   : > { %v2639_v4 = vpop.f32.mrf.mxu0  ;;  %v577_v25 = vadd.f32 %v576_v14, %v2580_v48 }
  0xb0   : > { %v544_v8 = vpop.f32.mrf.mxu1 }
  0xb2   : > { %v599_v21 = vpop.f32.mrf.mxu3 }
  0xb3   : > { %v600_v26 = vadd.f32 %v599_v21, %v2582_v49 }
  0xb4   : > { %v579_v38 = vpop.f32.mrf.mxu2 }
  0xb5   : > { %v580_v45 = vadd.f32 %v579_v38, %v2639_v4  ;;  %v784_v4 = vld [vmem:[%s3314_s3 + $0x158] sm:$0x3] }
  0xb7   : > { %v655_v29 = vpop.f32.mrf.mxu0 }
  0xb8   : > { %v684_v32 = vadd.f32 %v655_v29, %v577_v25  ;;  %v678_v33 = vpop.f32.mrf.mxu1 }
  0xb9   : > { %v685_v35 = vadd.f32 %v678_v33, %v600_v26  ;;  %v774_v26 = vld [vmem:[%s3314_s3 + $0x108] sm:$0xff]  ;;  %v1949_v33 = vld [vmem:[%s3314_s3 + $0x380] sm:$0xff] }
  0xba   : > { %v694_v37 = vadd.f32 %v690_v27, %v684_v32  ;;  %v602_v43 = vpop.f32.mrf.mxu3  ;;  %v1964_v32 = vld [vmem:[%s3314_s3 + $0x3f8] sm:$0xff] }
  0xbb   : > { %v695_v39 = vadd.f32 %v691_v30, %v685_v35  ;;  %v603_v47 = vadd.f32 %v602_v43, %v544_v8  ;;  %v1943_v43 = vld [vmem:[%s3314_s3 + $0x350] sm:$0xff] }
  0xbc   : > { %v698_v41 = vmax.f32 %v694_v37, 0.0  ;;  %v1956_v37 = vld [vmem:[%s3314_s3 + $0x3b8] sm:$0xff] }
  0xbd   : > { %v699_v42 = vmax.f32 %v695_v39, 0.0  ;;  %v1962_v39 = vld [vmem:[%s3314_s3 + $0x3e8] sm:$0xff] }
  0xbe   : > { %v707_v46 = vrot.slane %v698_v41, 7  ;;  %v1954_v41 = vld [vmem:[%s3314_s3 + $0x3a8] sm:$0xff] }
  0xbf   : > { %v708_v48 = vrot.slane %v699_v42, 7  ;;  %v658_v49 = vpop.f32.mrf.mxu0  ;;  %v1960_v42 = vld [vmem:[%s3314_s3 + $0x3d8] sm:$0xff] }
  0xc0   : > { %719 = vst [vmem:[#allocation3] sm:$0xfe] %v707_v46  ;;  %v686_v51 = vadd.f32 %v658_v49, %v580_v45  ;;  %v681_v52 = vpop.f32.mrf.mxu1  ;;  %v1952_v45 = vld [vmem:[%s3314_s3 + $0x398] sm:$0xff]  ;;  %v1950_v49 = vld [vmem:[%s3314_s3 + $0x388] sm:$0xff] }
  0xc1   : > { %721 = vst.msk [vmem:[#allocation3 + $0x8] sm:$0xfe] %vm720_vm5, %v708_v48  ;;  %v687_v53 = vadd.f32 %v681_v52, %v603_v47  ;;  %v1941_v47 = vld [vmem:[%s3314_s3 + $0x340] sm:$0xff]  ;;  %v1935_v52 = vld [vmem:[%s3314_s3 + $0x310] sm:$0xff] }
  0xc2   : > { %v696_v55 = vadd.f32 %v690_v27, %v686_v51  ;;  %v1966_v27 = vld [vmem:[%s3314_s3 + $0x408] sm:$0xff]  ;;  %v1948_v51 = vld [vmem:[%s3314_s3 + $0x378] sm:$0xff] }
  0xc3   : > { %v697_v56 = vadd.f32 %v691_v30, %v687_v53  ;;  %v1946_v53 = vld [vmem:[%s3314_s3 + $0x368] sm:$0xff] }
  0xc4   : > { %v700_v58 = vmax.f32 %v696_v55, 0.0  ;;  %v1944_v55 = vld [vmem:[%s3314_s3 + $0x358] sm:$0xff] }
  0xc5   : > { %v701_v59 = vmax.f32 %v697_v56, 0.0  ;;  %v1931_v56 = vld [vmem:[%s3314_s3 + $0x2f0] sm:$0xff] }
  0xc6   : > { %v709_v60 = vrot.slane %v700_v58, 7  ;;  %v1929_v58 = vld [vmem:[%s3314_s3 + $0x2e0] sm:$0xff] }
  0xc7   : > { %v711_v61 = vrot.slane %v701_v59, 7  ;;  %v2720_v62 = vld [vmem:[#allocation3] sm:$0xff] }
  0xc8   : > { %v785_v63 = vld [vmem:[#allocation3] sm:$0xfe]  ;;  %v2722_v0 = vsel %vm706_vm6, %v707_v46, %v709_v60  ;;  %725 = vst [vmem:[#allocation3 + $0x20] sm:$0x1] %v709_v60  ;;  %983 = vmatmul.f32.vlgmr.msra.gmra.mxu1 %v2720_v62  ;;  %v786_v8 = vld [vmem:[#allocation3 + $0x8] sm:$0xfe] }
  0xc9   : > { %v841_v1 = vrot.slane %v785_v63, 1  ;;  %v712_v2 = vsel %vm706_vm6, %v708_v48, %v711_v61  ;;  %v842_v3 = vrot.slane %v2722_v0, 1  ;;  %727 = vst.msk [vmem:[#allocation3 + $0x28] sm:$0x1] %vm726_vm8, %v711_v61  ;;  %v844_v14 = vrot.slane %v786_v8, 1  ;;  %v738_v36 = vld [vmem:[#allocation3 + $0x8] sm:$0xff] }
  0xca   : > { %724 = vst.msk [vmem:[#allocation3 + $0x18] sm:$0xff] %vm723_vm7, %v712_v2  ;;  %v1060_v16 = vld [vmem:[#allocation3 + $0x8] sm:$0xfc]  ;;  %v1958_v46 = vld [vmem:[%s3314_s3 + $0x3c8] sm:$0xff]  ;;  %v1939_v48 = vld [vmem:[%s3314_s3 + $0x330] sm:$0xff]  ;;  %v1114_v63 = vrot.slane %v2722_v0, 2 }
  0xcb   : > { %v2731_v5 = vsel %vm840_vm9, %v841_v1, %v842_v3  ;;  %v1116_v24 = vrot.slane %v1060_v16, 2  ;;  %v1059_v59 = vld [vmem:[#allocation3] sm:$0xfc]  ;;  %v1927_v61 = vld [vmem:[%s3314_s3 + $0x2d0] sm:$0xff]  ;;  %v1925_v2 = vld [vmem:[%s3314_s3 + $0x2c0] sm:$0xff] }
  0xcc   : > { %880 = vmatmul.f32.vlgmr.msrb.gmra.mxu2 %v2731_v5  ;;  %v1940_v60 = vld [vmem:[%s3314_s3 + $0x338] sm:$0xff]  ;;  %v1113_v1 = vrot.slane %v1059_v59, 2  ;;  %v1332_v16 = vld [vmem:[%s3316_s5 + $0x110] sm:$0xff]  ;;  %v1262_v59 = vld [vmem:[%s3316_s5 + $0x88] sm:$0xff] }
  0xcd   : > { %1922 = vmatpush.msk.msrb.mxu2 %vm857_vm3, %v784_v4  ;;  %v1934_v4 = vld [vmem:[%s3314_s3 + $0x308] sm:$0xff] }
  0xcf   : > { %v787_v10 = vld [vmem:[#allocation3 + $0x20] sm:$0x1]  ;;  %1047 = vmatpush.msrb.mxu2 %v782_v6 }
  0xd0   : > { %986 = vmatmul.f32.gmra.mxu1 %v2722_v0  ;;  %v847_v11 = vrot.slane %v787_v10, 1  ;;  %v788_v25 = vld [vmem:[#allocation3 + $0x28] sm:$0x1]  ;;  %v1932_v6 = vld [vmem:[%s3314_s3 + $0x2f8] sm:$0xff] }
  0xd1   : > { %v2745_v13 = vld [vmem:[#allocation3 + $0x18] sm:$0xff]  ;;  %1048 = vmatpush.msrb.mxu2 %v780_v7  ;;  %v849_v30 = vrot.slane %v788_v25, 1  ;;  %v1062_v31 = vld [vmem:[#allocation3 + $0x28] sm:$0x3]  ;;  %v1930_v7 = vld [vmem:[%s3314_s3 + $0x2e8] sm:$0xff] }
  0xd2   : > { %v845_v15 = vrot.slane %v2745_v13, 1  ;;  %v2749_v17 = vsel %vm840_vm9, %v842_v3, %v847_v11  ;;  %v1117_v19 = vrot.slane %v2745_v13, 2  ;;  %v1121_v35 = vrot.slane %v1062_v31, 2  ;;  %v1936_v3 = vld [vmem:[%s3314_s3 + $0x318] sm:$0xff]  ;;  %v1926_v11 = vld [vmem:[%s3314_s3 + $0x2c8] sm:$0xff] }
  0xd3   : > { %1049 = vmatpush.msrb.mxu2 %v778_v12  ;;  %v1928_v10 = vld [vmem:[%s3314_s3 + $0x2d8] sm:$0xff]  ;;  %v1254_v25 = vld [vmem:[%s3316_s5 + $0x48] sm:$0xff] }
  0xd4   : > { %v846_v21 = vsel %vm840_vm9, %v844_v14, %v845_v15  ;;  %883 = vmatmul.f32.gmra.mxu2 %v2749_v17  ;;  %v2778_v29 = vsel %vm1112_vm10, %v1116_v24, %v1117_v19  ;;  %v850_v38 = vsel %vm840_vm9, %v845_v15, %v849_v30  ;;  %v2815_v44 = vsel %vm1112_vm10, %v1117_v19, %v1121_v35  ;;  %v1333_v14 = vld [vmem:[%s3316_s5 + $0x118] sm:$0xff]  ;;  %v1259_v15 = vld [vmem:[%s3316_s5 + $0x70] sm:$0xff]  ;;  %v1257_v19 = vld [vmem:[%s3316_s5 + $0x60] sm:$0xff] }
  0xd5   : > { %1914 = vmatmul.msk.f32.vlgmr.msrb.gmra.mxu3 %vm723_vm7, %v846_v21  ;;  %1917 = vmatmul.msk.f32.vlgmr.msra.gmra.mxu0 %vm723_vm7, %v846_v21  ;;  %v1256_v21 = vld [vmem:[%s3316_s5 + $0x58] sm:$0xff]  ;;  %v1328_v24 = vld [vmem:[%s3316_s5 + $0xf0] sm:$0xff]  ;;  %v1323_v35 = vld [vmem:[%s3316_s5 + $0xc8] sm:$0xff] }
  0xd6   : > { %1135 = vmatpush.msrb.mxu3 %v1955_v18  ;;  %1050 = vmatpush.msrb.mxu2 %v776_v20  ;;  %v1331_v18 = vld [vmem:[%s3316_s5 + $0x108] sm:$0xff]  ;;  %v1330_v20 = vld [vmem:[%s3316_s5 + $0x100] sm:$0xff]  ;;  %v1252_v30 = vld [vmem:[%s3316_s5 + $0x38] sm:$0xff] }
  0xd7   : > { %1972 = vmatpush.msk.msra.mxu0 %vm857_vm3, %v1968_v22  ;;  %v1329_v22 = vld [vmem:[%s3316_s5 + $0xf8] sm:$0xff] }
  0xd8   : > { %1136 = vmatpush.msrb.mxu3 %v1953_v23  ;;  %1970 = vmatmul.msk.f32.vlgmr.msrb.gmra.mxu1 %vm723_vm7, %v2778_v29  ;;  %v1255_v23 = vld [vmem:[%s3316_s5 + $0x50] sm:$0xff]  ;;  %v1325_v31 = vld [vmem:[%s3316_s5 + $0xd8] sm:$0xff] }
  0xd9   : > { %1051 = vmatpush.msrb.mxu2 %v774_v26  ;;  %1215 = vmatpush.msra.mxu0 %v1966_v27  ;;  %v1327_v26 = vld [vmem:[%s3316_s5 + $0xe8] sm:$0xff] }
  0xda   : > { %1137 = vmatpush.msrb.mxu3 %v1951_v28  ;;  %v1253_v28 = vld [vmem:[%s3316_s5 + $0x40] sm:$0xff] }
  0xdb   : > { %1216 = vmatpush.msra.mxu0 %v1964_v32  ;;  %v1251_v32 = vld [vmem:[%s3316_s5 + $0x30] sm:$0xff] }
  0xdc   : > { %1138 = vmatpush.msrb.mxu3 %v1949_v33  ;;  %1920 = vmatmul.msk.f32.vlgmr.msra.gmra.mxu2 %vm723_vm7, %v738_v36  ;;  %v1324_v33 = vld [vmem:[%s3316_s5 + $0xd0] sm:$0xff] }
  0xdd   : > { %1915 = vmatmul.msk.f32.gmra.mxu3 %vm723_vm7, %v850_v38  ;;  %1918 = vmatmul.msk.f32.gmra.mxu0 %vm723_vm7, %v850_v38 }
  0xde   : > { %1139 = vmatpush.msrb.mxu3 %v1947_v34  ;;  %1181 = vmatpush.msra.mxu2 %v1956_v37  ;;  %v1250_v34 = vld [vmem:[%s3316_s5 + $0x28] sm:$0xff] }
  0xdf   : > { %1217 = vmatpush.msra.mxu0 %v1962_v39  ;;  %v1249_v39 = vld [vmem:[%s3316_s5 + $0x20] sm:$0xff] }
  0xe0   : > { %1140 = vmatpush.msrb.mxu3 %v1945_v40  ;;  %1971 = vmatmul.msk.f32.gmra.mxu1 %vm723_vm7, %v2815_v44  ;;  %v1322_v40 = vld [vmem:[%s3316_s5 + $0xc0] sm:$0xff] }
  0xe1   : > { %1182 = vmatpush.msra.mxu2 %v1954_v41  ;;  %1218 = vmatpush.msra.mxu0 %v1960_v42  ;;  %v1248_v41 = vld [vmem:[%s3316_s5 + $0x18] sm:$0xff] }
  0xe2   : > { %1141 = vmatpush.msrb.mxu3 %v1943_v43  ;;  %v1321_v42 = vld [vmem:[%s3316_s5 + $0xb8] sm:$0xff]  ;;  %v1247_v43 = vld [vmem:[%s3316_s5 + $0x10] sm:$0xff] }
  0xe3   : > { %1183 = vmatpush.msra.mxu2 %v1952_v45  ;;  %1219 = vmatpush.msra.mxu0 %v1958_v46  ;;  %v1246_v46 = vld [vmem:[%s3316_s5 + $0x8] sm:$0xff] }
  0xe4   : > { %1142 = vmatpush.msrb.mxu3 %v1941_v47  ;;  %1921 = vmatmul.msk.f32.gmra.mxu2 %vm723_vm7, %v2745_v13  ;;  %v1319_v47 = vld [vmem:[%s3316_s5 + $0xa8] sm:$0xff] }
  0xe5   : > { %926 = vmatmul.f32.vlgmr.msra.gmra.mxu3 %v2731_v5  ;;  %1029 = vmatmul.f32.vlgmr.msrb.gmra.mxu0 %v2720_v62  ;;  %v1938_v62 = vld [vmem:[%s3314_s3 + $0x328] sm:$0xff]  ;;  %v1061_v5 = vld [vmem:[#allocation3 + $0x20] sm:$0x3] }
  0xe6   : > { %1143 = vmatpush.msrb.mxu3 %v1939_v48  ;;  %1184 = vmatpush.msra.mxu2 %v1950_v49  ;;  %v1119_v8 = vrot.slane %v1061_v5, 2 }
  0xe7   : > { %1338 = vmatpush.msrb.mxu0 %v1333_v14 }
  0xe8   : > { %1144 = vmatpush.msrb.mxu3 %v1937_v50  ;;  %1185 = vmatpush.msra.mxu2 %v1948_v51  ;;  %v1120_v12 = vsel %vm1112_vm10, %v1114_v63, %v1119_v8  ;;  %v1245_v51 = vld [vmem:[%s3316_s5] sm:$0xff] }
  0xe9   : > { %1339 = vmatpush.msrb.mxu0 %v1332_v16 }
  0xea   : > { %1145 = vmatpush.msrb.mxu3 %v1935_v52  ;;  %1186 = vmatpush.msra.mxu2 %v1946_v53  ;;  %v1318_v52 = vld [vmem:[%s3316_s5 + $0xa0] sm:$0xff]  ;;  %v1264_v53 = vld [vmem:[%s3316_s5 + $0x98] sm:$0xff] }
  0xeb   : > { %1340 = vmatpush.msrb.mxu0 %v1331_v18 }
  0xec   : > { %1146 = vmatpush.msrb.mxu3 %v1933_v54  ;;  %1187 = vmatpush.msra.mxu2 %v1944_v55  ;;  %v1337_v54 = vld [vmem:[%s3316_s5 + $0x138] sm:$0xff]  ;;  %v1263_v55 = vld [vmem:[%s3316_s5 + $0x90] sm:$0xff] }
  0xed   : > { %929 = vmatmul.f32.gmra.mxu3 %v2749_v17  ;;  %1032 = vmatmul.f32.gmra.mxu0 %v2722_v0  ;;  %v1115_v0 = vsel %vm1112_vm10, %v1113_v1, %v1114_v63  ;;  %v1258_v17 = vld [vmem:[%s3316_s5 + $0x68] sm:$0xff] }
  0xee   : > { %1147 = vmatpush.msrb.mxu3 %v1931_v56  ;;  %1188 = vmatpush.msra.mxu2 %v1942_v57  ;;  %v1336_v56 = vld [vmem:[%s3316_s5 + $0x130] sm:$0xff] }
  0xef   : > { %1923 = vmatmul.msk.f32.vlgmr.msrb.gmra.mxu2 %vm723_vm7, %v738_v36  ;;  %1341 = vmatpush.msrb.mxu0 %v1330_v20 }
  0xf0   : > { %1148 = vmatpush.msrb.mxu3 %v1929_v58  ;;  %1189 = vmatpush.msra.mxu2 %v1940_v60  ;;  %v1335_v60 = vld [vmem:[%s3316_s5 + $0x128] sm:$0xff] }
  0xf1   : > { %1342 = vmatpush.msrb.mxu0 %v1329_v22 }
  0xf2   : > { %1149 = vmatpush.msrb.mxu3 %v1927_v61  ;;  %1190 = vmatpush.msra.mxu2 %v1938_v62  ;;  %v1261_v61 = vld [vmem:[%s3316_s5 + $0x80] sm:$0xff] }
  0xf3   : > { %1343 = vmatpush.msrb.mxu0 %v1328_v24  ;;  %v1334_v62 = vld [vmem:[%s3316_s5 + $0x120] sm:$0xff] }
  0xf4   : > { %1150 = vmatpush.msrb.mxu3 %v1925_v2  ;;  %1191 = vmatpush.msra.mxu2 %v1936_v3 }
  0xf5   : > { %1151 = vmatmul.f32.vlgmr.msrb.gmra.mxu3 %v1115_v0  ;;  %1973 = vmatmul.msk.f32.vlgmr.msra.gmra.mxu0 %vm723_vm7, %v2778_v29  ;;  %v1326_v29 = vld [vmem:[%s3316_s5 + $0xe0] sm:$0xff] }
  0xf6   : > { %1192 = vmatpush.msra.mxu2 %v1934_v4  ;;  %1344 = vmatpush.msrb.mxu0 %v1327_v26 }
  0xf7   : > { %1924 = vmatmul.msk.f32.gmra.mxu2 %vm723_vm7, %v2745_v13  ;;  %v1260_v13 = vld [vmem:[%s3316_s5 + $0x78] sm:$0xff]  ;;  %1307 = vmatpush.msra.mxu3 %v1264_v53  ;;  %v2004_v53 = vld [vmem:[%s3317_s6 + $0x108] sm:$0xff] }
  0xf8   : > { %1193 = vmatpush.msra.mxu2 %v1932_v6  ;;  %1272 = vmatpush.msra.mxu1 %v1260_v13  ;;  %v1231_v6 = vld [vmem:[%s3315_s4] sm:$0x3] }
  0xf9   : > { %1345 = vmatpush.msrb.mxu0 %v1326_v29  ;;  %1308 = vmatpush.msra.mxu3 %v1263_v55  ;;  %v1406_v55 = vld [vmem:[%s3317_s6 + $0x40] sm:$0xff] }
  0xfa   : > { %1194 = vmatpush.msra.mxu2 %v1930_v7  ;;  %1273 = vmatpush.msra.mxu1 %v1259_v15 }
  0xfb   : > { %1346 = vmatpush.msrb.mxu0 %v1325_v31  ;;  %1309 = vmatpush.msra.mxu3 %v1262_v59  ;;  %v2002_v59 = vld [vmem:[%s3317_s6 + $0xf8] sm:$0xff] }
  0xfc   : > { %1195 = vmatpush.msra.mxu2 %v1928_v10  ;;  %1274 = vmatpush.msra.mxu1 %v1258_v17 }
  0xfd   : > { %1154 = vmatmul.f32.gmra.mxu3 %v1120_v12  ;;  %1974 = vmatmul.msk.f32.gmra.mxu0 %vm723_vm7, %v2815_v44  ;;  %v1320_v44 = vld [vmem:[%s3316_s5 + $0xb0] sm:$0xff] }
  0xfe   : > { %1196 = vmatpush.msra.mxu2 %v1926_v11  ;;  %1275 = vmatpush.msra.mxu1 %v1257_v19 }
  0xff   : > { %1197 = vmatmul.f32.vlgmr.msra.gmra.mxu2 %v1115_v0  ;;  %1347 = vmatpush.msrb.mxu0 %v1324_v33 }
 0x100   : > { %1276 = vmatpush.msra.mxu1 %v1256_v21  ;;  %1373 = vmatpush.msrb.mxu2 %v1337_v54  ;;  %v1987_v54 = vld [vmem:[%s3317_s6 + $0xa0] sm:$0xff] }
 0x101   : > { %1348 = vmatpush.msrb.mxu0 %v1323_v35  ;;  %1310 = vmatpush.msra.mxu3 %v1261_v61  ;;  %v1404_v61 = vld [vmem:[%s3317_s6 + $0x30] sm:$0xff] }
 0x102   : > { %1277 = vmatpush.msra.mxu1 %v1255_v23  ;;  %1374 = vmatpush.msrb.mxu2 %v1336_v56  ;;  %v2003_v56 = vld [vmem:[%s3317_s6 + $0x100] sm:$0xff] }
 0x103   : > { %1349 = vmatpush.msrb.mxu0 %v1322_v40 }
 0x104   : > { %1278 = vmatpush.msra.mxu1 %v1254_v25  ;;  %1375 = vmatpush.msrb.mxu2 %v1335_v60  ;;  %v1985_v60 = vld [vmem:[%s3317_s6 + $0x90] sm:$0xff] }
 0x105   : > { %1350 = vmatpush.msrb.mxu0 %v1321_v42 }
 0x106   : > { %1279 = vmatpush.msra.mxu1 %v1253_v28  ;;  %1376 = vmatpush.msrb.mxu2 %v1334_v62  ;;  %v2001_v62 = vld [vmem:[%s3317_s6 + $0xf0] sm:$0xff] }
 0x107   : > { %1200 = vmatmul.f32.gmra.mxu2 %v1120_v12  ;;  %1351 = vmatpush.msrb.mxu0 %v1320_v44  ;;  %v1233_v12 = vperm.slane %v1231_v6, 0 }
 0x108   : > { %1280 = vmatpush.msra.mxu1 %v1252_v30  ;;  %v1234_v30 = vperm.slane %v1231_v6, 1  ;;  %v1401_v6 = vld [vmem:[%s3317_s6 + $0x18] sm:$0xff] }
 0x109   : > { %1352 = vmatpush.msrb.mxu0 %v1319_v47  ;;  %v2006_v47 = vld [vmem:[%s3317_s6 + $0x118] sm:$0x3] }
 0x10a   : > { %1281 = vmatpush.msra.mxu1 %v1251_v32  ;;  %2007 = vmatpush.msk.msra.mxu2 %vm857_vm3, %v2006_v47  ;;  %v1525_v47 = vld [vmem:[%s3319_s8 + $0x10] sm:$0xff] }
 0x10b   : > { %1353 = vmatpush.msrb.mxu0 %v1318_v52  ;;  %v1407_v52 = vld [vmem:[%s3317_s6 + $0x48] sm:$0xff] }
 0x10c   : > { %1282 = vmatpush.msra.mxu1 %v1250_v34 }
 0x10e   : > { %1283 = vmatpush.msra.mxu1 %v1249_v39 }
 0x110   : > { %1284 = vmatpush.msra.mxu1 %v1248_v41 }
 0x112   : > { %1285 = vmatpush.msra.mxu1 %v1247_v43 }
 0x114   : > { %1286 = vmatpush.msra.mxu1 %v1246_v46  ;;  %v1409_v46 = vld [vmem:[%s3317_s6 + $0x58] sm:$0x3] }
 0x116   : > { %1287 = vmatpush.msra.mxu1 %v1245_v51  ;;  %v1988_v51 = vld [vmem:[%s3317_s6 + $0xa8] sm:$0xff] }
 0x118   : > { %1993 = vmatpush.msk.msrb.mxu1 %vm857_vm3, %v1409_v46  ;;  %v1558_v46 = vld [vmem:[%s3319_s8 + $0x58] sm:$0xff] }
 0x145   : > { %v984_v49 = vpop.f32.mrf.mxu1 }
 0x14d   : > { %v987_v63 = vpop.f32.mrf.mxu1 }
 0x14f   : > { %v2949_v27 = vpop.f32.mrf.mxu2 }
 0x152   : > { %v950_v37 = vpop.f32.mrf.mxu0 }
 0x155   : > { %v1175_v0 = vpop.f32.mrf.mxu1 }
 0x157   : > { %v884_v36 = vpop.f32.mrf.mxu2 }
 0x158   : > { %v904_v38 = vpop.f32.mrf.mxu3 }
 0x159   : > { %v905_v4 = vadd.f32 %v904_v38, %v2949_v27 }
 0x15a   : > { %v953_v50 = vpop.f32.mrf.mxu0 }
 0x15b   : > { %v985_v7 = vadd.f32 %v984_v49, %v905_v4  ;;  %v1408_v49 = vld [vmem:[%s3317_s6 + $0x50] sm:$0xff]  ;;  %v1402_v4 = vld [vmem:[%s3317_s6 + $0x20] sm:$0xff] }
 0x15c   : > { %1461 = vmatpush.msrb.mxu1 %v1408_v49  ;;  %v1524_v49 = vld [vmem:[%s3319_s8 + $0x8] sm:$0xff] }
 0x15d   : > { %v1178_v18 = vpop.f32.mrf.mxu1 }
 0x15e   : > { %1462 = vmatpush.msrb.mxu1 %v1407_v52  ;;  %v1555_v52 = vld [vmem:[%s3319_s8 + $0x40] sm:$0xff] }
 0x15f   : > { %v1007_v45 = vpop.f32.mrf.mxu2 }
 0x160   : > { %v907_v48 = vpop.f32.mrf.mxu3  ;;  %v1008_v10 = vadd.f32 %v1007_v45, %v985_v7  ;;  %v1990_v45 = vld [vmem:[%s3317_s6 + $0xb8] sm:$0x3]  ;;  %1463 = vmatpush.msrb.mxu1 %v1406_v55 }
 0x161   : > { %v908_v14 = vadd.f32 %v907_v48, %v884_v36  ;;  %1991 = vmatpush.msk.msrb.mxu3 %vm857_vm3, %v1990_v45  ;;  %v1989_v48 = vld [vmem:[%s3317_s6 + $0xb0] sm:$0xff]  ;;  %v1998_v7 = vld [vmem:[%s3317_s6 + $0xd8] sm:$0xff] }
 0x162   : > { %v1030_v1 = vpop.f32.mrf.mxu0  ;;  %v1526_v45 = vld [vmem:[%s3319_s8 + $0x18] sm:$0xff] }
 0x163   : > { %v988_v19 = vadd.f32 %v987_v63, %v908_v14  ;;  %1435 = vmatpush.msrb.mxu3 %v1989_v48  ;;  %v1984_v63 = vld [vmem:[%s3317_s6 + $0x88] sm:$0xff]  ;;  %v1557_v48 = vld [vmem:[%s3319_s8 + $0x50] sm:$0xff] }
 0x164   : > { %v1996_v14 = vld [vmem:[%s3317_s6 + $0xc8] sm:$0xff] }
 0x165   : > { %1436 = vmatpush.msrb.mxu3 %v1988_v51  ;;  %v1523_v51 = vld [vmem:[%s3319_s8] sm:$0xff] }
 0x167   : > { %v1010_v58 = vpop.f32.mrf.mxu2  ;;  %1437 = vmatpush.msrb.mxu3 %v1987_v54 }
 0x168   : > { %v927_v57 = vpop.f32.mrf.mxu3  ;;  %v1011_v23 = vadd.f32 %v1010_v58, %v988_v19  ;;  %v1405_v58 = vld [vmem:[%s3317_s6 + $0x38] sm:$0xff] }
 0x169   : > { %v951_v16 = vadd.f32 %v950_v37, %v927_v57  ;;  %v1986_v57 = vld [vmem:[%s3317_s6 + $0x98] sm:$0xff]  ;;  %1464 = vmatpush.msrb.mxu1 %v1405_v58 }
 0x16a   : > { %v1033_v5 = vpop.f32.mrf.mxu0  ;;  %1438 = vmatpush.msrb.mxu3 %v1986_v57 }
 0x16b   : > { %v1031_v24 = vadd.f32 %v1030_v1, %v951_v16  ;;  %1465 = vmatpush.msrb.mxu1 %v1404_v61  ;;  %v1403_v1 = vld [vmem:[%s3317_s6 + $0x28] sm:$0xff]  ;;  %v1596_v61 = vld [vmem:[%s3320_s9 + $0x18] sm:$0xff] }
 0x16c   : > { %1439 = vmatpush.msrb.mxu3 %v1985_v60 }
 0x16d   : > { %1466 = vmatpush.msrb.mxu1 %v1403_v1  ;;  %v1595_v1 = vld [vmem:[%s3320_s9 + $0x10] sm:$0xff] }
 0x16e   : > { %1440 = vmatpush.msrb.mxu3 %v1984_v63  ;;  %v1686_v63 = vld [vmem:[%s3320_s9 + $0x78] sm:$0xff] }
 0x16f   : > { %1467 = vmatpush.msrb.mxu1 %v1402_v4  ;;  %v1594_v4 = vld [vmem:[%s3320_s9 + $0x8] sm:$0xff] }
 0x170   : > { %v930_v2 = vpop.f32.mrf.mxu3 }
 0x171   : > { %v954_v31 = vadd.f32 %v953_v50, %v930_v2  ;;  %v2005_v50 = vld [vmem:[%s3317_s6 + $0x110] sm:$0xff]  ;;  %v2000_v2 = vld [vmem:[%s3317_s6 + $0xe8] sm:$0xff]  ;;  %1468 = vmatpush.msrb.mxu1 %v1401_v6  ;;  %v1593_v6 = vld [vmem:[%s3320_s9] sm:$0xff] }
 0x172   : > { %v1053_v3 = vpop.f32.mrf.mxu2  ;;  %v1221_v21 = vpop.f32.mrf.mxu0  ;;  %1501 = vmatpush.msra.mxu2 %v2005_v50  ;;  %v1556_v50 = vld [vmem:[%s3319_s8 + $0x48] sm:$0xff] }
 0x173   : > { %v1054_v27 = vadd.f32 %v1053_v3, %v1031_v24  ;;  %v1034_v36 = vadd.f32 %v1033_v5, %v954_v31  ;;  %v1983_v3 = vld [vmem:[%s3317_s6 + $0x80] sm:$0xff]  ;;  %v1982_v5 = vld [vmem:[%s3317_s6 + $0x78] sm:$0xff] }
 0x174   : > { %1502 = vmatpush.msra.mxu2 %v2004_v53  ;;  %1441 = vmatpush.msrb.mxu3 %v1983_v3  ;;  %v1685_v3 = vld [vmem:[%s3320_s9 + $0x70] sm:$0xff] }
 0x176   : > { %1503 = vmatpush.msra.mxu2 %v2003_v56  ;;  %1442 = vmatpush.msrb.mxu3 %v1982_v5  ;;  %v2059_v56 = vld [vmem:[%s3318_s7] ss:$0 sm:$0xff]  ;;  %v1684_v5 = vld [vmem:[%s3320_s9 + $0x68] sm:$0xff] }
 0x178   : > { %v1152_v8 = vpop.f32.mrf.mxu3  ;;  %1504 = vmatpush.msra.mxu2 %v2002_v59 }
 0x179   : > { %v1176_v11 = vadd.f32 %v1175_v0, %v1152_v8  ;;  %v1999_v0 = vld [vmem:[%s3317_s6 + $0xe0] sm:$0xff]  ;;  %v1981_v8 = vld [vmem:[%s3317_s6 + $0x70] sm:$0xff] }
 0x17a   : > { %v1056_v13 = vpop.f32.mrf.mxu2  ;;  %v1224_v38 = vpop.f32.mrf.mxu0  ;;  %1505 = vmatpush.msra.mxu2 %v2001_v62  ;;  %1443 = vmatpush.msrb.mxu3 %v1981_v8  ;;  %v1626_v62 = vld [vmem:[%s3320_s9 + $0x38] sm:$0xff]  ;;  %v1683_v8 = vld [vmem:[%s3320_s9 + $0x60] sm:$0xff] }
 0x17b   : > { %v1227_v15 = vadd.f32 %v1176_v11, %v1008_v10  ;;  %v1057_v40 = vadd.f32 %v1056_v13, %v1034_v36  ;;  %v1400_v10 = vld [vmem:[%s3317_s6 + $0x10] sm:$0xff]  ;;  %v1399_v13 = vld [vmem:[%s3317_s6 + $0x8] sm:$0xff] }
 0x17c   : > { %1506 = vmatpush.msra.mxu2 %v2000_v2  ;;  %v1997_v11 = vld [vmem:[%s3317_s6 + $0xd0] sm:$0xff]  ;;  %1469 = vmatpush.msrb.mxu1 %v1400_v10  ;;  %v1656_v10 = vld [vmem:[%s3320_s9 + $0x58] sm:$0xff] }
 0x17d   : > { %v1237_v17 = vadd.f32 %v1233_v12, %v1227_v15  ;;  %v1398_v15 = vld [vmem:[%s3317_s6] sm:$0xff]  ;;  %v1625_v2 = vld [vmem:[%s3320_s9 + $0x30] sm:$0xff] }
 0x17e   : > { %1507 = vmatpush.msra.mxu2 %v1999_v0  ;;  %1470 = vmatpush.msrb.mxu1 %v1399_v13  ;;  %v1624_v0 = vld [vmem:[%s3320_s9 + $0x28] sm:$0xff]  ;;  %v1653_v13 = vld [vmem:[%s3320_s9 + $0x40] sm:$0xff] }
 0x17f   : > { %v1241_v20 = vmax.f32 %v1237_v17, 0.0 }
 0x180   : > { %v1155_v22 = vpop.f32.mrf.mxu3  ;;  %1508 = vmatpush.msra.mxu2 %v1998_v7  ;;  %1471 = vmatpush.msrb.mxu1 %v1398_v15  ;;  %v1623_v7 = vld [vmem:[%s3320_s9 + $0x20] sm:$0xff] }
 0x181   : > { %v1179_v25 = vadd.f32 %v1178_v18, %v1155_v22  ;;  %1288 = vmatmul.f32.vlgmr.msra.gmra.mxu1 %v1241_v20  ;;  %1354 = vmatmul.f32.vlgmr.msrb.gmra.mxu0 %v1241_v20  ;;  %v1995_v18 = vld [vmem:[%s3317_s6 + $0xc0] sm:$0xff] }
 0x182   : > { %v1198_v26 = vpop.f32.mrf.mxu2  ;;  %1509 = vmatpush.msra.mxu2 %v1997_v11  ;;  %1612 = vmatpush.msra.mxu1 %v1596_v61  ;;  %v1655_v11 = vld [vmem:[%s3320_s9 + $0x50] sm:$0xff] }
 0x183   : > { %v1229_v28 = vadd.f32 %v1179_v25, %v1011_v23  ;;  %v1222_v29 = vadd.f32 %v1221_v21, %v1198_v26 }
 0x184   : > { %1510 = vmatpush.msra.mxu2 %v1996_v14  ;;  %1613 = vmatpush.msra.mxu1 %v1595_v1 }
 0x185   : > { %v1228_v32 = vadd.f32 %v1222_v29, %v1054_v27  ;;  %v1239_v33 = vadd.f32 %v1233_v12, %v1229_v28  ;;  %v1980_v12 = vld [vmem:[%s3317_s6 + $0x68] sm:$0xff] }
 0x186   : > { %1444 = vmatpush.msrb.mxu3 %v1980_v12  ;;  %1511 = vmatpush.msra.mxu2 %v1995_v18  ;;  %v1654_v12 = vld [vmem:[%s3320_s9 + $0x48] sm:$0xff] }
 0x187   : > { %v1238_v34 = vadd.f32 %v1234_v30, %v1228_v32  ;;  %v1243_v35 = vmax.f32 %v1239_v33, 0.0  ;;  %1614 = vmatpush.msra.mxu1 %v1594_v4 }
 0x188   : > { %1445 = vmatpush.msrb.mxu3 %v1979_v9 }
 0x189   : > { %v1242_v37 = vmax.f32 %v1238_v34, 0.0  ;;  %1291 = vmatmul.f32.gmra.mxu1 %v1243_v35  ;;  %1357 = vmatmul.f32.gmra.mxu0 %v1243_v35 }
 0x18a   : > { %v1201_v39 = vpop.f32.mrf.mxu2  ;;  %1615 = vmatpush.msra.mxu1 %v1593_v6 }
 0x18b   : > { %v1225_v41 = vadd.f32 %v1224_v38, %v1201_v39  ;;  %1975 = vmatmul.msk.f32.vlgmr.msra.gmra.mxu3 %vm1265_vm11, %v1242_v37  ;;  %1977 = vmatmul.msk.f32.vlgmr.msrb.gmra.mxu2 %vm1265_vm11, %v1242_v37  ;;  %v1530_v37 = vld [vmem:[%s3319_s8 + $0x38] sm:$0xff]  ;;  %v1529_v39 = vld [vmem:[%s3319_s8 + $0x30] sm:$0xff] }
 0x18c   : > { %v1562_v38 = vld [vmem:[%s3319_s8 + $0x78] sm:$0xff]  ;;  %1543 = vmatpush.msra.mxu0 %v1530_v37  ;;  %1702 = vmatpush.msrb.mxu2 %v1686_v63  ;;  %v1716_v37 = vld [vmem:[%s3323_s12] sm:$0x1] }
 0x18d   : > { %v1230_v42 = vadd.f32 %v1225_v41, %v1057_v40  ;;  %1571 = vmatpush.msra.mxu3 %v1562_v38  ;;  %v1561_v40 = vld [vmem:[%s3319_s8 + $0x70] sm:$0xff]  ;;  %v1528_v41 = vld [vmem:[%s3319_s8 + $0x28] sm:$0xff] }
 0x18e   : > { %1544 = vmatpush.msra.mxu0 %v1529_v39  ;;  %1703 = vmatpush.msrb.mxu2 %v1685_v3 }
 0x18f   : > { %v1240_v43 = vadd.f32 %v1234_v30, %v1230_v42  ;;  %v1560_v42 = vld [vmem:[%s3319_s8 + $0x68] sm:$0xff]  ;;  %1572 = vmatpush.msra.mxu3 %v1561_v40 }
 0x190   : > { %1545 = vmatpush.msra.mxu0 %v1528_v41  ;;  %1704 = vmatpush.msrb.mxu2 %v1684_v5 }
 0x191   : > { %v1244_v44 = vmax.f32 %v1240_v43, 0.0  ;;  %1573 = vmatpush.msra.mxu3 %v1560_v42  ;;  %v1527_v43 = vld [vmem:[%s3319_s8 + $0x20] sm:$0xff] }
 0x192   : > { %1546 = vmatpush.msra.mxu0 %v1527_v43  ;;  %1705 = vmatpush.msrb.mxu2 %v1683_v8 }
 0x193   : > { %1976 = vmatmul.msk.f32.gmra.mxu3 %vm1265_vm11, %v1244_v44  ;;  %1978 = vmatmul.msk.f32.gmra.mxu2 %vm1265_vm11, %v1244_v44  ;;  %v1559_v44 = vld [vmem:[%s3319_s8 + $0x60] sm:$0xff] }
 0x194   : > { %1574 = vmatpush.msra.mxu3 %v1559_v44  ;;  %1547 = vmatpush.msra.mxu0 %v1526_v45 }
 0x196   : > { %1575 = vmatpush.msra.mxu3 %v1558_v46  ;;  %1548 = vmatpush.msra.mxu0 %v1525_v47 }
 0x198   : > { %1576 = vmatpush.msra.mxu3 %v1557_v48  ;;  %1549 = vmatpush.msra.mxu0 %v1524_v49 }
 0x19a   : > { %1577 = vmatpush.msra.mxu3 %v1556_v50  ;;  %1550 = vmatpush.msra.mxu0 %v1523_v51 }
 0x19c   : > { %1578 = vmatpush.msra.mxu3 %v1555_v52  ;;  %1642 = vmatpush.msrb.mxu0 %v1626_v62 }
 0x19e   : > { %1643 = vmatpush.msrb.mxu0 %v1625_v2 }
 0x1a0   : > { %1644 = vmatpush.msrb.mxu0 %v1624_v0 }
 0x1a2   : > { %1645 = vmatpush.msrb.mxu0 %v1623_v7 }
 0x1fe   : > { %v1289_v16 = vpop.f32.mrf.mxu1  ;;  %v1355_v17 = vpop.f32.mrf.mxu0 }
 0x206   : > { %v1292_v24 = vpop.f32.mrf.mxu1  ;;  %v1358_v25 = vpop.f32.mrf.mxu0 }
 0x20e   : > { %v1312_v19 = vpop.f32.mrf.mxu3  ;;  %v1378_v20 = vpop.f32.mrf.mxu2 }
 0x20f   : > { %v1313_v21 = vadd.f32 %v1312_v19, %v1289_v16  ;;  %v1379_v22 = vadd.f32 %v1378_v20, %v1355_v17 }
 0x211   : > { %v1384_v23 = vmax.f32 %v1313_v21, %v1379_v22 }
 0x213   : > { %1387 = vst.msk [vmem:[#allocation4] sm:$0xff] %vm1386_vm13, %v1384_v23  ;;  %v1715_v23 = vld [vmem:[%s3322_s11 + $0x18] sm:$0xff] }
 0x216   : > { %v1315_v26 = vpop.f32.mrf.mxu3  ;;  %v1381_v27 = vpop.f32.mrf.mxu2 }
 0x217   : > { %v1316_v28 = vadd.f32 %v1315_v26, %v1292_v24  ;;  %v1382_v29 = vadd.f32 %v1381_v27, %v1358_v25  ;;  %v1714_v24 = vld [vmem:[%s3322_s11 + $0x10] sm:$0xff]  ;;  %v1713_v25 = vld [vmem:[%s3322_s11 + $0x8] sm:$0xff]  ;;  %v1712_v26 = vld [vmem:[%s3322_s11] sm:$0xff] }
 0x218   : > { %v1591_v27 = vld [vmem:[%s3321_s10] sm:$0x1] }
 0x219   : > { %v1385_v30 = vmax.f32 %v1316_v28, %v1382_v29 }
 0x21b   : > { %1388 = vst.msk [vmem:[#allocation4 + $0x8] sm:$0xff] %vm1386_vm13, %v1385_v30 }
 0x222   : > { %v1391_v31 = vld [vmem:[#allocation4] ss:$2 sm:$0xff]  ;;  %v1393_v32 = vld [vmem:[#allocation4 + $0x1] ss:$2 sm:$0xff] }
 0x223   : > { %v1394_v33 = vmax.f32 %v1391_v31, %v1393_v32 }
 0x225   : > { %1395 = vst.msk [vmem:[#allocation5 + $0x1] sm:$0xff] %vm1386_vm13, %v1394_v33 }
 0x22c   : > { %v1410_v34 = vld [vmem:[#allocation5 + $0x1] sm:$0xff] }
 0x22d   : > { %v1397_v35 = vld [vmem:[#allocation5] sm:$0xff]  ;;  %1992 = vmatmul.msk.f32.vlgmr.msrb.gmra.mxu3 %vm1386_vm13, %v1410_v34 }
 0x22e   : > { %v1476_v36 = vld [vmem:[#allocation5 + $0x2] sm:$0xff]  ;;  %1994 = vmatmul.msk.f32.vlgmr.msrb.gmra.mxu1 %vm1386_vm13, %v1397_v35  ;;  %1732 = vmatpush.msrb.mxu3 %v1715_v23 }
 0x22f   : > { %2008 = vmatmul.msk.f32.vlgmr.msra.gmra.mxu2 %vm1386_vm13, %v1476_v36  ;;  %1672 = vmatpush.msrb.mxu1 %v1656_v10 }
 0x230   : > { %1733 = vmatpush.msrb.mxu3 %v1714_v24 }
 0x231   : > { %1673 = vmatpush.msrb.mxu1 %v1655_v11 }
 0x232   : > { %1734 = vmatpush.msrb.mxu3 %v1713_v25 }
 0x233   : > { %1674 = vmatpush.msrb.mxu1 %v1654_v12 }
 0x234   : > { %1735 = vmatpush.msrb.mxu3 %v1712_v26 }
 0x235   : > { %1675 = vmatpush.msrb.mxu1 %v1653_v13 }
 0x2ab   : > { %v1473_v53 = vpop.f32.mrf.mxu1 }
 0x2b0   : > { %v1447_v54 = vpop.f32.mrf.mxu3 }
 0x2b1   : > { %v1474_v55 = vadd.f32 %v1473_v53, %v1447_v54 }
 0x2b2   : > { %v1513_v57 = vpop.f32.mrf.mxu2 }
 0x2b3   : > { %v1516_v58 = vadd.f32 %v1513_v57, %v1474_v55 }
 0x2b5   : > { %v1521_v59 = vadd.f32 %v2059_v56, %v1516_v58 }
 0x2b7   : > { %v1522_v60 = vmax.f32 %v1521_v59, 0.0 }
 0x2b9   : > { %2009 = vmatmul.msk.f32.vlgmr.msra.gmra.mxu0 %vm1531_vm14, %v1522_v60  ;;  %2010 = vmatmul.msk.f32.vlgmr.msra.gmra.mxu3 %vm1531_vm14, %v1522_v60 }
 0x336   : > { %v1552_v14 = vpop.f32.mrf.mxu0 }
 0x33c   : > { %v1580_v9 = vpop.f32.mrf.mxu3 }
 0x33d   : > { %v1583_v15 = vmax.f32 %v1552_v14, %v1580_v9 }
 0x33f   : > { %1584 = vst.msk [vmem:[#allocation6] sm:$0xff] %vm1265_vm11, %v1583_v15 }
 0x346   : > { %v1585_v16 = vld [vmem:[#allocation6] ss:$2 sm:$0xf]  ;;  %v1587_v17 = vld [vmem:[#allocation6 + $0x1] ss:$2 sm:$0xf] }
 0x347   : > { %v1588_v18 = vmax.f32 %v1585_v16, %v1587_v17 }
 0x349   : > { %1590 = vst.msk [vmem:[#allocation7] sm:$0xf] %vm1589_vm15, %v1588_v18 }
 0x350   : > { %v1592_v19 = vld [vmem:[#allocation7] ss:$4 sm:$0x1]  ;;  %v1622_v20 = vld [vmem:[#allocation7 + $0x1] ss:$4 sm:$0x1] }
 0x351   : > { %2011 = vmatmul.msk.f32.vlgmr.msra.gmra.mxu1 %vm1265_vm11, %v1592_v19  ;;  %2012 = vmatmul.msk.f32.vlgmr.msrb.gmra.mxu0 %vm1265_vm11, %v1622_v20  ;;  %v1682_v21 = vld [vmem:[#allocation7 + $0x3] ss:$4 sm:$0x1]  ;;  %v1652_v22 = vld [vmem:[#allocation7 + $0x2] ss:$4 sm:$0x1] }
 0x352   : > { %2014 = vmatmul.msk.f32.vlgmr.msrb.gmra.mxu2 %vm1265_vm11, %v1682_v21 }
 0x359   : > { %2013 = vmatmul.msk.f32.vlgmr.msrb.gmra.mxu1 %vm1265_vm11, %v1652_v22 }
 0x3ce   : > { %v1617_v28 = vpop.f32.mrf.mxu1  ;;  %v1647_v30 = vpop.f32.mrf.mxu0 }
 0x3cf   : > { %v1620_v29 = vadd.f32 %v1617_v28, %v1591_v27 }
 0x3d1   : > { %v1650_v31 = vadd.f32 %v1647_v30, %v1620_v29 }
 0x3d5   : > { %v1707_v34 = vpop.f32.mrf.mxu2 }
 0x3d6   : > { %v1677_v32 = vpop.f32.mrf.mxu1 }
 0x3d7   : > { %v1680_v33 = vadd.f32 %v1677_v32, %v1650_v31 }
 0x3d9   : > { %v1710_v35 = vadd.f32 %v1707_v34, %v1680_v33 }
 0x3db   : > { %v1711_v36 = vmax.f32 %v1710_v35, 0.0 }
 0x3dd   : > { %2015 = vmatmul.msk.f32.vlgmr.msrb.gmra.mxu3 %vm1265_vm11, %v1711_v36 }
 0x460   : > { %v1737_v38 = vpop.f32.mrf.mxu3 }
 0x461   : > { %v1738_v39 = vadd.f32 %v1737_v38, %v1716_v37 }
 0x463   : > { %1741 = vst.msk [vmem:[%s432_s15] sm:$0x1] %vm1740_vm0, %v1738_v39 }
 0x464   : > { %2087 = shalt.err (!%p2084_p3)
}
 0x465   : > { %2019 = dma.vmem_to_hbm [thread:$0]  (%p2233_p5), %s1754_s22, 16, %s1756_s23, %s1743_s27  }
 0x466 PF: > { %p2025_p4 = scmp.ge.s32.totalorder %s2122_s28, 2  ;;  %s1767_s21 = sand.u32 1, %s2110_s25  }
 0x467   : > { %s1768_s15 = scalar_lea.sflag [#allocation9], %s1767_s21 }
 0x468   : > { %p2022_p7 = pnand %p2025_p4, %p2237_p6 }
 0x46a   : > { %p2023_p8 = pneg %p2022_p7 }
 0x46c   : > { %2105 = dma.done.wait (%p2023_p8), %s1768_s15, 16  }
 0x46d   : > { %2107 = vsyncadd (%p2023_p8), %s1768_s15, 4294967280  ;;  %s3336_s28 = sld [smem:[#allocation12_spill]]  ;;  %s3339_s25 = smov %s2114_s26 }
 0x46e   : > { %s3337_s24 = sld [smem:[#allocation11_spill]] }
 0x46f   : > { %s3338_s27 = sld [smem:[#allocation13_spill]] }
 0x473   : > { %p23_p9 = scmp.ge.s32.totalorder %s3336_s28, 4  }
 0x474   : > { %s3340_s26 = smov %s3337_s24 }
 0x475   :  { %25 = sbr.rel (!%p23_p9) target bundleno = 3 (0x3), region = 119 }
 0x47a   :  { %1773 = vsyncpa [#allocation9], 1 }
 0x47b   :  { %1775 = vsyncpa [#allocation9 + $0x1], 1 }

</bundles_post_ra>
